<compile_context>
chip_gen: v7x
topology: tpu7x:2x2x1
jax: 0.10.0
libtpu: 0.0.40
codegen_flags: <defaults>
</compile_context>

<pallas_src>
import functools
import math

import jax
import jax.numpy as jnp
from jax.experimental import pallas as pl
from jax.experimental.pallas import tpu as pltpu

LN_EPS = 1e-5            # PyTorch nn.LayerNorm default
NEG_INF = -1e30          # finite mask bias (avoids exp(-inf - -inf) NaN risk)
GELU_K = math.sqrt(2.0 / math.pi)


# ----------------------------- in-kernel helpers -----------------------------
def _layernorm(x, w, b):
    mu = jnp.mean(x, axis=-1, keepdims=True)
    var = jnp.mean((x - mu) ** 2, axis=-1, keepdims=True)
    return (x - mu) * jax.lax.rsqrt(var + LN_EPS) * w + b


def _gelu_new(x):
    return 0.5 * x * (1.0 + jnp.tanh(GELU_K * (x + 0.044715 * x ** 3)))


def _full_spec(arr):
    nd = arr.ndim
    return pl.BlockSpec(arr.shape, lambda *args, _nd=nd: (0,) * _nd)


# ------------------------------ transformer block -----------------------------
def _block_kernel(n_head,
                  x_ref, ln1w_ref, ln1b_ref, wqkv_ref, bqkv_ref,
                  wpr_ref, bpr_ref, ln2w_ref, ln2b_ref,
                  wfc_ref, bfc_ref, wp2_ref, bp2_ref,
                  o_ref):
    x = x_ref[0]                                  # (T, C) f32
    T, C = x.shape
    hs = C // n_head
    scale = 1.0 / math.sqrt(hs)

    # ---- attention (pre-LN) ----
    h = _layernorm(x, ln1w_ref[...], ln1b_ref[...])
    qkv = jnp.dot(h.astype(jnp.bfloat16), wqkv_ref[...],
                  preferred_element_type=jnp.float32) + bqkv_ref[...]   # (T, 3C)

    # Fold softmax scale into q; expose the head axis as a dot_general batch
    # dim so all heads go through the MXU in one batched contraction.
    q = (qkv[:, :C] * scale).reshape(T, n_head, hs).astype(jnp.bfloat16)
    k = qkv[:, C:2 * C].reshape(T, n_head, hs).astype(jnp.bfloat16)
    v = qkv[:, 2 * C:].reshape(T, n_head, hs).astype(jnp.bfloat16)

    s = jnp.einsum('qhd,khd->hqk', q, k,
                   preferred_element_type=jnp.float32)    # (H, T, T) f32

    # single additive causal bias, shared across all heads
    row = jax.lax.broadcasted_iota(jnp.int32, (T, T), 0)
    col = jax.lax.broadcasted_iota(jnp.int32, (T, T), 1)
    s = s + jnp.where(col <= row, 0.0, NEG_INF)[None, :, :]

    s = s - jnp.max(s, axis=-1, keepdims=True)
    p = jnp.exp(s)
    denom = jnp.sum(p, axis=-1, keepdims=True)
    p = p * pl.reciprocal(denom, approx=True)             # EUP, not VALU

    y = jnp.einsum('hqk,khd->qhd', p.astype(jnp.bfloat16), v,
                   preferred_element_type=jnp.float32).reshape(T, C)
    y = jnp.dot(y.astype(jnp.bfloat16), wpr_ref[...],
                preferred_element_type=jnp.float32) + bpr_ref[...]
    x = x + y

    # ---- MLP (pre-LN) ----
    h = _layernorm(x, ln2w_ref[...], ln2b_ref[...])
    h = jnp.dot(h.astype(jnp.bfloat16), wfc_ref[...],
                preferred_element_type=jnp.float32) + bfc_ref[...]
    h = _gelu_new(h)                                       # f32 elementwise
    h = jnp.dot(h.astype(jnp.bfloat16), wp2_ref[...],
                preferred_element_type=jnp.float32) + bp2_ref[...]

    o_ref[0] = x + h


def apply_block(x, blk, n_head):
    B, T, C = x.shape
    bf16 = jnp.bfloat16
    # matmul weights in bf16 (halves VMEM/DMA bytes); biases & LN params f32
    weights = [blk["ln1_w"], blk["ln1_b"],
               blk["w_qkv"].astype(bf16), blk["b_qkv"],
               blk["w_proj"].astype(bf16), blk["b_proj"],
               blk["ln2_w"], blk["ln2_b"],
               blk["w_fc"].astype(bf16), blk["b_fc"],
               blk["w_p2"].astype(bf16), blk["b_p2"]]

    return pl.pallas_call(
        functools.partial(_block_kernel, n_head),
        out_shape=jax.ShapeDtypeStruct((B, T, C), jnp.float32),
        grid=(B,),
        in_specs=[pl.BlockSpec((1, T, C), lambda b: (b, 0, 0))]
                 + [_full_spec(w) for w in weights],
        out_specs=pl.BlockSpec((1, T, C), lambda b: (b, 0, 0)),
        input_output_aliases={0: 0},     # residual stream updated in place
        compiler_params=pltpu.CompilerParams(dimension_semantics=("parallel",)),
    )(x, *weights)


# ---------------------------- final LN + lm_head ------------------------------
def _final_kernel(x_ref, lnw_ref, lnb_ref, wlm_ref, o_ref):
    x = x_ref[0]                                  # (T, C)
    h = _layernorm(x, lnw_ref[...], lnb_ref[...])
    o_ref[0] = jnp.dot(h.astype(jnp.bfloat16), wlm_ref[...],
                       preferred_element_type=jnp.float32)


def _choose_tile_v(V, max_tile=2048):
    # lane-dense vocab tiles (multiples of 128) when possible; else full V
    if V % 128 == 0:
        for cand in (2048, 1024, 512, 256, 128):
            if cand <= max_tile and V % cand == 0:
                return cand
    return V


def apply_final(x, lnf_w, lnf_b, w_lm):
    B, T, C = x.shape
    V = w_lm.shape[1]
    tv = _choose_tile_v(V)

    return pl.pallas_call(
        _final_kernel,
        out_shape=jax.ShapeDtypeStruct((B, T, V), jnp.float32),
        grid=(B, V // tv),
        in_specs=[pl.BlockSpec((1, T, C), lambda b, j: (b, 0, 0)),
                  pl.BlockSpec(lnf_w.shape, lambda b, j: (0, 0)),
                  pl.BlockSpec(lnf_b.shape, lambda b, j: (0, 0)),
                  pl.BlockSpec((C, tv), lambda b, j: (0, j))],
        out_specs=pl.BlockSpec((1, T, tv), lambda b, j: (b, 0, j)),
        compiler_params=pltpu.CompilerParams(
            dimension_semantics=("parallel", "parallel")),
    )(x, lnf_w, lnf_b, w_lm.astype(jnp.bfloat16))


# ------------------------------- full forward ---------------------------------
def gpt_forward(idx, params, n_head):
    # embedding gathers (glue, plain JAX)
    B, T = idx.shape
    tok_emb = params["wte"][idx]                   # (B, T, C)
    pos_emb = params["wpe"][:T][None, :, :]        # (1, T, C)
    x = tok_emb + pos_emb                          # drop(p=0) == identity
    for blk in params["blocks"]:
        x = apply_block(x, blk, n_head)
    logits = apply_final(x, params["lnf_w"], params["lnf_b"], params["w_lm"])
    return logits


# ------------------------- pure-JAX reference (check) -------------------------
def _ref_forward(idx, params, n_head):
    def ln(x, w, b):
        mu = x.mean(-1, keepdims=True)
        var = ((x - mu) ** 2).mean(-1, keepdims=True)
        return (x - mu) / jnp.sqrt(var + LN_EPS) * w + b

    B, T = idx.shape
    x = params["wte"][idx] + params["wpe"][:T][None]
    for blk in params["blocks"]:
        C = x.shape[-1]
        hs = C // n_head
        h = ln(x, blk["ln1_w"], blk["ln1_b"])
        qkv = h @ blk["w_qkv"] + blk["b_qkv"]
        q, k, v = jnp.split(qkv, 3, axis=-1)
        q = q.reshape(B, T, n_head, hs).transpose(0, 2, 1, 3)
        k = k.reshape(B, T, n_head, hs).transpose(0, 2, 1, 3)
        v = v.reshape(B, T, n_head, hs).transpose(0, 2, 1, 3)
        att = (q @ k.transpose(0, 1, 3, 2)) / math.sqrt(hs)
        mask = jnp.tril(jnp.ones((T, T), bool))
        att = jnp.where(mask, att, -jnp.inf)
        att = jax.nn.softmax(att, axis=-1)
        y = (att @ v).transpose(0, 2, 1, 3).reshape(B, T, C)
        x = x + y @ blk["w_proj"] + blk["b_proj"]
        h = ln(x, blk["ln2_w"], blk["ln2_b"])
        h = h @ blk["w_fc"] + blk["b_fc"]
        h = 0.5 * h * (1.0 + jnp.tanh(GELU_K * (h + 0.044715 * h ** 3)))
        x = x + h @ blk["w_p2"] + blk["b_p2"]
    x = ln(x, params["lnf_w"], params["lnf_b"])
    return x @ params["w_lm"]


# ---------------------------------- params ------------------------------------
def init_params(key, vocab_size, block_size, n_layer, n_embd):
    C = n_embd
    ks = jax.random.split(key, 4 + 4 * n_layer)
    std, std_proj = 0.02, 0.02 / math.sqrt(2 * n_layer)
    params = {
        "wte": jax.random.normal(ks[0], (vocab_size, C), jnp.float32) * std,
        "wpe": jax.random.normal(ks[1], (block_size, C), jnp.float32) * std,
        "lnf_w": jnp.ones((1, C), jnp.float32),
        "lnf_b": jnp.zeros((1, C), jnp.float32),
        "w_lm": jax.random.normal(ks[2], (C, vocab_size), jnp.float32) * std,
        "blocks": [],
    }
    for l in range(n_layer):
        k0, k1, k2, k3 = ks[4 + 4 * l: 8 + 4 * l]
        params["blocks"].append(dict(
            ln1_w=jnp.ones((1, C), jnp.float32),
            ln1_b=jnp.zeros((1, C), jnp.float32),
            w_qkv=jax.random.normal(k0, (C, 3 * C), jnp.float32) * std,
            b_qkv=jnp.zeros((1, 3 * C), jnp.float32),
            w_proj=jax.random.normal(k1, (C, C), jnp.float32) * std_proj,
            b_proj=jnp.zeros((1, C), jnp.float32),
            ln2_w=jnp.ones((1, C), jnp.float32),
            ln2_b=jnp.zeros((1, C), jnp.float32),
            w_fc=jax.random.normal(k2, (C, 4 * C), jnp.float32) * std,
            b_fc=jnp.zeros((1, 4 * C), jnp.float32),
            w_p2=jax.random.normal(k3, (4 * C, C), jnp.float32) * std_proj,
            b_p2=jnp.zeros((1, C), jnp.float32),
        ))
    return params


# ------------------------------------ main -------------------------------------
if __name__ == "__main__":
    vocab_size, block_size, n_layer, n_head, n_embd = 64, 16, 2, 2, 32
    B, T = 2, 8

    key = jax.random.PRNGKey(0)
    pkey, ikey = jax.random.split(key)
    params = init_params(pkey, vocab_size, block_size, n_layer, n_embd)
    idx = jax.random.randint(ikey, (B, T), 0, vocab_size, dtype=jnp.int32)

    forward = jax.jit(gpt_forward, static_argnums=(2,))
    logits = forward(idx, params, n_head)
    logits = jax.block_until_ready(logits)

    ref = _ref_forward(idx, params, n_head)
    assert logits.shape == (B, T, vocab_size)
    # bf16 MXU operands + approx reciprocal => compare against the f32
    # reference with a correspondingly looser tolerance.
    assert jnp.allclose(logits, ref, rtol=2e-2, atol=2e-2), "mismatch vs reference"

    print("KERNEL_OK")
</pallas_src>

<mosaic_0001>
module attributes {stable_mosaic.version = 11 : i64} {
  func.func @_final_kernel(%arg0: i32, %arg1: i32, %arg2: memref<1x8x32xf32, #tpu.memory_space<vmem>>, %arg3: memref<1x32xf32, #tpu.memory_space<vmem>>, %arg4: memref<1x32xf32, #tpu.memory_space<vmem>>, %arg5: memref<32x64xbf16, #tpu.memory_space<vmem>>, %arg6: memref<1x8x64xf32, #tpu.memory_space<vmem>>) attributes {dimension_semantics = [#tpu.dimension_semantics<parallel>, #tpu.dimension_semantics<parallel>], iteration_bounds = array<i64: 2, 1>, scalar_prefetch = 0 : i64, scratch_operands = 0 : i64, tpu.core_type = #tpu.core_type<tc>, window_params = [{transform_indices = @transform_0, window_bounds = array<i64: 1, 8, 32>}, {pipeline_mode = #tpu.pipeline_mode<synchronous>, transform_indices = @transform_1, window_bounds = array<i64: 1, 32>}, {pipeline_mode = #tpu.pipeline_mode<synchronous>, transform_indices = @transform_2, window_bounds = array<i64: 1, 32>}, {transform_indices = @transform_3, window_bounds = array<i64: 32, 64>}, {transform_indices = @transform_4, window_bounds = array<i64: 1, 8, 64>}]} {
    %c0 = arith.constant 0 : index
    %c0_0 = arith.constant 0 : index
    %c0_1 = arith.constant 0 : index
    %0 = vector.load %arg2[%c0, %c0_0, %c0_1] : memref<1x8x32xf32, #tpu.memory_space<vmem>>, vector<1x8x32xf32>
    %1 = vector.shape_cast %0 : vector<1x8x32xf32> to vector<8x32xf32>
    %c0_2 = arith.constant 0 : index
    %c0_3 = arith.constant 0 : index
    %2 = vector.load %arg3[%c0_2, %c0_3] : memref<1x32xf32, #tpu.memory_space<vmem>>, vector<1x32xf32>
    %c0_4 = arith.constant 0 : index
    %c0_5 = arith.constant 0 : index
    %3 = vector.load %arg4[%c0_4, %c0_5] : memref<1x32xf32, #tpu.memory_space<vmem>>, vector<1x32xf32>
    %cst = arith.constant dense<0.000000e+00> : vector<8xf32>
    %4 = vector.multi_reduction <add>, %1, %cst [1] : vector<8x32xf32> to vector<8xf32>
    %5 = vector.shape_cast %4 : vector<8xf32> to vector<8x1xf32>
    %cst_6 = arith.constant 3.200000e+01 : f32
    %6 = vector.broadcast %cst_6 : f32 to vector<8x1xf32>
    %7 = arith.divf %5, %6 : vector<8x1xf32>
    %8 = vector.broadcast %7 : vector<8x1xf32> to vector<8x32xf32>
    %9 = arith.subf %1, %8 : vector<8x32xf32>
    %10 = arith.mulf %9, %9 : vector<8x32xf32>
    %cst_7 = arith.constant dense<0.000000e+00> : vector<8xf32>
    %11 = vector.multi_reduction <add>, %10, %cst_7 [1] : vector<8x32xf32> to vector<8xf32>
    %12 = vector.shape_cast %11 : vector<8xf32> to vector<8x1xf32>
    %cst_8 = arith.constant 3.200000e+01 : f32
    %13 = vector.broadcast %cst_8 : f32 to vector<8x1xf32>
    %14 = arith.divf %12, %13 : vector<8x1xf32>
    %15 = vector.broadcast %7 : vector<8x1xf32> to vector<8x32xf32>
    %16 = arith.subf %1, %15 : vector<8x32xf32>
    %cst_9 = arith.constant 9.99999974E-6 : f32
    %17 = vector.broadcast %cst_9 : f32 to vector<8x1xf32>
    %18 = arith.addf %14, %17 : vector<8x1xf32>
    %19 = math.rsqrt %18 : vector<8x1xf32>
    %20 = vector.broadcast %19 : vector<8x1xf32> to vector<8x32xf32>
    %21 = arith.mulf %16, %20 : vector<8x32xf32>
    %22 = vector.broadcast %2 : vector<1x32xf32> to vector<8x32xf32>
    %23 = arith.mulf %21, %22 : vector<8x32xf32>
    %24 = vector.broadcast %3 : vector<1x32xf32> to vector<8x32xf32>
    %25 = arith.addf %23, %24 : vector<8x32xf32>
    %26 = arith.truncf %25 : vector<8x32xf32> to vector<8x32xbf16>
    %c0_10 = arith.constant 0 : index
    %c0_11 = arith.constant 0 : index
    %27 = vector.load %arg5[%c0_10, %c0_11] : memref<32x64xbf16, #tpu.memory_space<vmem>>, vector<32x64xbf16>
    %cst_12 = arith.constant dense<0.000000e+00> : vector<8x64xf32>
    %28 = tpu.matmul %26, %27, %cst_12 {dimension_numbers = #tpu.dot_dimension_numbers<[1], [0], [0], [1], [0, 0, 1, 1], [], []>} : vector<8x32xbf16>, vector<32x64xbf16>, vector<8x64xf32> -> vector<8x64xf32>
    %c0_13 = arith.constant 0 : index
    %c0_14 = arith.constant 0 : index
    %c0_15 = arith.constant 0 : index
    %29 = vector.load %arg6[%c0_13, %c0_14, %c0_15] : memref<1x8x64xf32, #tpu.memory_space<vmem>>, vector<1x8x64xf32>
    %30 = vector.shape_cast %29 : vector<1x8x64xf32> to vector<8x64xf32>
    %31 = vector.shape_cast %28 : vector<8x64xf32> to vector<1x8x64xf32>
    tpu.vector_store %arg6[%c0_13, %c0_14, %c0_15], %31 {strides = array<i32>} : memref<1x8x64xf32, #tpu.memory_space<vmem>>, vector<1x8x64xf32>,
    return
  }
  func.func @transform_0(%arg0: i32, %arg1: i32) -> (i32, i32, i32) {
    %c0_i32 = arith.constant 0 : i32
    %c0_i32_0 = arith.constant 0 : i32
    %c0_i32_1 = arith.constant 0 : i32
    return %arg0, %c0_i32, %c0_i32_0 : i32, i32, i32
  }
  func.func @transform_1(%arg0: i32, %arg1: i32) -> (i32, i32) {
    %c0_i32 = arith.constant 0 : i32
    %c0_i32_0 = arith.constant 0 : i32
    %c0_i32_1 = arith.constant 0 : i32
    return %c0_i32, %c0_i32_0 : i32, i32
  }
  func.func @transform_2(%arg0: i32, %arg1: i32) -> (i32, i32) {
    %c0_i32 = arith.constant 0 : i32
    %c0_i32_0 = arith.constant 0 : i32
    %c0_i32_1 = arith.constant 0 : i32
    return %c0_i32, %c0_i32_0 : i32, i32
  }
  func.func @transform_3(%arg0: i32, %arg1: i32) -> (i32, i32) {
    %c0_i32 = arith.constant 0 : i32
    %c0_i32_0 = arith.constant 0 : i32
    return %c0_i32, %arg1 : i32, i32
  }
  func.func @transform_4(%arg0: i32, %arg1: i32) -> (i32, i32, i32) {
    %c0_i32 = arith.constant 0 : i32
    %c0_i32_0 = arith.constant 0 : i32
    return %arg0, %c0_i32, %arg1 : i32, i32, i32
  }
}

module attributes {stable_mosaic.version = 11 : i64} {
  func.func @_block_kernel(%arg0: i32, %arg1: memref<1x8x32xf32, #tpu.memory_space<vmem>>, %arg2: memref<1x32xf32, #tpu.memory_space<vmem>>, %arg3: memref<1x32xf32, #tpu.memory_space<vmem>>, %arg4: memref<32x96xbf16, #tpu.memory_space<vmem>>, %arg5: memref<1x96xf32, #tpu.memory_space<vmem>>, %arg6: memref<32x32xbf16, #tpu.memory_space<vmem>>, %arg7: memref<1x32xf32, #tpu.memory_space<vmem>>, %arg8: memref<1x32xf32, #tpu.memory_space<vmem>>, %arg9: memref<1x32xf32, #tpu.memory_space<vmem>>, %arg10: memref<32x128xbf16, #tpu.memory_space<vmem>>, %arg11: memref<1x128xf32, #tpu.memory_space<vmem>>, %arg12: memref<128x32xbf16, #tpu.memory_space<vmem>>, %arg13: memref<1x32xf32, #tpu.memory_space<vmem>>, %arg14: memref<1x8x32xf32, #tpu.memory_space<vmem>>) attributes {dimension_semantics = [#tpu.dimension_semantics<parallel>], iteration_bounds = array<i64: 2>, scalar_prefetch = 0 : i64, scratch_operands = 0 : i64, tpu.core_type = #tpu.core_type<tc>, window_params = [{transform_indices = @transform_0, window_bounds = array<i64: 1, 8, 32>}, {pipeline_mode = #tpu.pipeline_mode<synchronous>, transform_indices = @transform_1, window_bounds = array<i64: 1, 32>}, {pipeline_mode = #tpu.pipeline_mode<synchronous>, transform_indices = @transform_2, window_bounds = array<i64: 1, 32>}, {pipeline_mode = #tpu.pipeline_mode<synchronous>, transform_indices = @transform_3, window_bounds = array<i64: 32, 96>}, {pipeline_mode = #tpu.pipeline_mode<synchronous>, transform_indices = @transform_4, window_bounds = array<i64: 1, 96>}, {pipeline_mode = #tpu.pipeline_mode<synchronous>, transform_indices = @transform_5, window_bounds = array<i64: 32, 32>}, {pipeline_mode = #tpu.pipeline_mode<synchronous>, transform_indices = @transform_6, window_bounds = array<i64: 1, 32>}, {pipeline_mode = #tpu.pipeline_mode<synchronous>, transform_indices = @transform_7, window_bounds = array<i64: 1, 32>}, {pipeline_mode = #tpu.pipeline_mode<synchronous>, transform_indices = @transform_8, window_bounds = array<i64: 1, 32>}, {pipeline_mode = #tpu.pipeline_mode<synchronous>, transform_indices = @transform_9, window_bounds = array<i64: 32, 128>}, {pipeline_mode = #tpu.pipeline_mode<synchronous>, transform_indices = @transform_10, window_bounds = array<i64: 1, 128>}, {pipeline_mode = #tpu.pipeline_mode<synchronous>, transform_indices = @transform_11, window_bounds = array<i64: 128, 32>}, {pipeline_mode = #tpu.pipeline_mode<synchronous>, transform_indices = @transform_12, window_bounds = array<i64: 1, 32>}, {transform_indices = @transform_13, window_bounds = array<i64: 1, 8, 32>}]} {
    %c0 = arith.constant 0 : index
    %c0_0 = arith.constant 0 : index
    %c0_1 = arith.constant 0 : index
    %0 = vector.load %arg1[%c0, %c0_0, %c0_1] : memref<1x8x32xf32, #tpu.memory_space<vmem>>, vector<1x8x32xf32>
    %1 = vector.shape_cast %0 : vector<1x8x32xf32> to vector<8x32xf32>
    %c0_2 = arith.constant 0 : index
    %c0_3 = arith.constant 0 : index
    %2 = vector.load %arg2[%c0_2, %c0_3] : memref<1x32xf32, #tpu.memory_space<vmem>>, vector<1x32xf32>
    %c0_4 = arith.constant 0 : index
    %c0_5 = arith.constant 0 : index
    %3 = vector.load %arg3[%c0_4, %c0_5] : memref<1x32xf32, #tpu.memory_space<vmem>>, vector<1x32xf32>
    %cst = arith.constant dense<0.000000e+00> : vector<8xf32>
    %4 = vector.multi_reduction <add>, %1, %cst [1] : vector<8x32xf32> to vector<8xf32>
    %5 = vector.shape_cast %4 : vector<8xf32> to vector<8x1xf32>
    %cst_6 = arith.constant 3.200000e+01 : f32
    %6 = vector.broadcast %cst_6 : f32 to vector<8x1xf32>
    %7 = arith.divf %5, %6 : vector<8x1xf32>
    %8 = vector.broadcast %7 : vector<8x1xf32> to vector<8x32xf32>
    %9 = arith.subf %1, %8 : vector<8x32xf32>
    %10 = arith.mulf %9, %9 : vector<8x32xf32>
    %cst_7 = arith.constant dense<0.000000e+00> : vector<8xf32>
    %11 = vector.multi_reduction <add>, %10, %cst_7 [1] : vector<8x32xf32> to vector<8xf32>
    %12 = vector.shape_cast %11 : vector<8xf32> to vector<8x1xf32>
    %cst_8 = arith.constant 3.200000e+01 : f32
    %13 = vector.broadcast %cst_8 : f32 to vector<8x1xf32>
    %14 = arith.divf %12, %13 : vector<8x1xf32>
    %15 = vector.broadcast %7 : vector<8x1xf32> to vector<8x32xf32>
    %16 = arith.subf %1, %15 : vector<8x32xf32>
    %cst_9 = arith.constant 9.99999974E-6 : f32
    %17 = vector.broadcast %cst_9 : f32 to vector<8x1xf32>
    %18 = arith.addf %14, %17 : vector<8x1xf32>
    %19 = math.rsqrt %18 : vector<8x1xf32>
    %20 = vector.broadcast %19 : vector<8x1xf32> to vector<8x32xf32>
    %21 = arith.mulf %16, %20 : vector<8x32xf32>
    %22 = vector.broadcast %2 : vector<1x32xf32> to vector<8x32xf32>
    %23 = arith.mulf %21, %22 : vector<8x32xf32>
    %24 = vector.broadcast %3 : vector<1x32xf32> to vector<8x32xf32>
    %25 = arith.addf %23, %24 : vector<8x32xf32>
    %26 = arith.truncf %25 : vector<8x32xf32> to vector<8x32xbf16>
    %c0_10 = arith.constant 0 : index
    %c0_11 = arith.constant 0 : index
    %27 = vector.load %arg4[%c0_10, %c0_11] : memref<32x96xbf16, #tpu.memory_space<vmem>>, vector<32x96xbf16>
    %cst_12 = arith.constant dense<0.000000e+00> : vector<8x96xf32>
    %28 = tpu.matmul %26, %27, %cst_12 {dimension_numbers = #tpu.dot_dimension_numbers<[1], [0], [0], [1], [0, 0, 1, 1], [], []>} : vector<8x32xbf16>, vector<32x96xbf16>, vector<8x96xf32> -> vector<8x96xf32>
    %c0_13 = arith.constant 0 : index
    %c0_14 = arith.constant 0 : index
    %29 = vector.load %arg5[%c0_13, %c0_14] : memref<1x96xf32, #tpu.memory_space<vmem>>, vector<1x96xf32>
    %30 = vector.broadcast %29 : vector<1x96xf32> to vector<8x96xf32>
    %31 = arith.addf %28, %30 : vector<8x96xf32>
    %32 = vector.extract_strided_slice %31 {offsets = [0, 0], sizes = [8, 32], strides = [1, 1]} : vector<8x96xf32> to vector<8x32xf32>
    %cst_15 = arith.constant 2.500000e-01 : f32
    %33 = vector.broadcast %cst_15 : f32 to vector<8x32xf32>
    %34 = arith.mulf %32, %33 : vector<8x32xf32>
    %35 = vector.shape_cast %34 : vector<8x32xf32> to vector<8x2x16xf32>
    %36 = arith.truncf %35 : vector<8x2x16xf32> to vector<8x2x16xbf16>
    %37 = vector.extract_strided_slice %31 {offsets = [0, 32], sizes = [8, 32], strides = [1, 1]} : vector<8x96xf32> to vector<8x32xf32>
    %38 = vector.shape_cast %37 : vector<8x32xf32> to vector<8x2x16xf32>
    %39 = arith.truncf %38 : vector<8x2x16xf32> to vector<8x2x16xbf16>
    %40 = vector.extract_strided_slice %31 {offsets = [0, 64], sizes = [8, 32], strides = [1, 1]} : vector<8x96xf32> to vector<8x32xf32>
    %41 = vector.shape_cast %40 : vector<8x32xf32> to vector<8x2x16xf32>
    %42 = arith.truncf %41 : vector<8x2x16xf32> to vector<8x2x16xbf16>
    "tpu.trace_start"() <{level = 10 : i32, message = "qhd,khd->hqk"}> : () -> ()
    %cst_16 = arith.constant dense<0.000000e+00> : vector<2x8x8xf32>
    %43 = tpu.matmul %36, %39, %cst_16 {dimension_numbers = #tpu.dot_dimension_numbers<[2], [2], [0], [0], [0, 1, 0, 0, 1, 0], [1], [1]>} : vector<8x2x16xbf16>, vector<8x2x16xbf16>, vector<2x8x8xf32> -> vector<2x8x8xf32>
    "tpu.trace_stop"() : () -> ()
    %44 = tpu.iota {dimensions = array<i32: 0>} : vector<8x8xi32>
    %45 = tpu.iota {dimensions = array<i32: 1>} : vector<8x8xi32>
    %46 = arith.cmpi sle, %45, %44 : vector<8x8xi32>
    %cst_17 = arith.constant 0.000000e+00 : f32
    %cst_18 = arith.constant -1.000000e+30 : f32
    %47 = vector.broadcast %cst_17 : f32 to vector<8x8xf32>
    %48 = vector.broadcast %cst_18 : f32 to vector<8x8xf32>
    %49 = arith.select %46, %47, %48 : vector<8x8xi1>, vector<8x8xf32>
    %50 = vector.shape_cast %49 : vector<8x8xf32> to vector<1x8x8xf32>
    %51 = vector.broadcast %50 : vector<1x8x8xf32> to vector<2x8x8xf32>
    %52 = arith.addf %43, %51 : vector<2x8x8xf32>
    %cst_19 = arith.constant dense<0xFF800000> : vector<2x8xf32>
    %53 = vector.multi_reduction <maximumf>, %52, %cst_19 [2] : vector<2x8x8xf32> to vector<2x8xf32>
    %54 = vector.shape_cast %53 : vector<2x8xf32> to vector<2x8x1xf32>
    %55 = vector.broadcast %54 : vector<2x8x1xf32> to vector<2x8x8xf32>
    %56 = arith.subf %52, %55 : vector<2x8x8xf32>
    %57 = math.exp %56 : vector<2x8x8xf32>
    %cst_20 = arith.constant dense<0.000000e+00> : vector<2x8xf32>
    %58 = vector.multi_reduction <add>, %57, %cst_20 [2] : vector<2x8x8xf32> to vector<2x8xf32>
    %59 = vector.shape_cast %58 : vector<2x8xf32> to vector<2x8x1xf32>
    %60 = tpu.reciprocal %59 {approx = true} : vector<2x8x1xf32> -> vector<2x8x1xf32>
    %61 = vector.broadcast %60 : vector<2x8x1xf32> to vector<2x8x8xf32>
    %62 = arith.mulf %57, %61 : vector<2x8x8xf32>
    %63 = arith.truncf %62 : vector<2x8x8xf32> to vector<2x8x8xbf16>
    "tpu.trace_start"() <{level = 10 : i32, message = "hqk,khd->qhd"}> : () -> ()
    %cst_21 = arith.constant dense<0.000000e+00> : vector<2x16x8xf32>
    %64 = tpu.matmul %42, %63, %cst_21 {dimension_numbers = #tpu.dot_dimension_numbers<[0], [2], [2], [1], [0, 1, 0, 2, 1, 1], [1], [0]>} : vector<8x2x16xbf16>, vector<2x8x8xbf16>, vector<2x16x8xf32> -> vector<2x16x8xf32>
    %65 = tpu.transpose %64, [2, 0, 1] : vector<2x16x8xf32> -> vector<8x2x16xf32>
    "tpu.trace_stop"() : () -> ()
    %66 = vector.shape_cast %65 : vector<8x2x16xf32> to vector<8x32xf32>
    %67 = arith.truncf %66 : vector<8x32xf32> to vector<8x32xbf16>
    %c0_22 = arith.constant 0 : index
    %c0_23 = arith.constant 0 : index
    %68 = vector.load %arg6[%c0_22, %c0_23] : memref<32x32xbf16, #tpu.memory_space<vmem>>, vector<32x32xbf16>
    %cst_24 = arith.constant dense<0.000000e+00> : vector<8x32xf32>
    %69 = tpu.matmul %67, %68, %cst_24 {dimension_numbers = #tpu.dot_dimension_numbers<[1], [0], [0], [1], [0, 0, 1, 1], [], []>} : vector<8x32xbf16>, vector<32x32xbf16>, vector<8x32xf32> -> vector<8x32xf32>
    %c0_25 = arith.constant 0 : index
    %c0_26 = arith.constant 0 : index
    %70 = vector.load %arg7[%c0_25, %c0_26] : memref<1x32xf32, #tpu.memory_space<vmem>>, vector<1x32xf32>
    %71 = vector.broadcast %70 : vector<1x32xf32> to vector<8x32xf32>
    %72 = arith.addf %69, %71 : vector<8x32xf32>
    %73 = arith.addf %1, %72 : vector<8x32xf32>
    %c0_27 = arith.constant 0 : index
    %c0_28 = arith.constant 0 : index
    %74 = vector.load %arg8[%c0_27, %c0_28] : memref<1x32xf32, #tpu.memory_space<vmem>>, vector<1x32xf32>
    %c0_29 = arith.constant 0 : index
    %c0_30 = arith.constant 0 : index
    %75 = vector.load %arg9[%c0_29, %c0_30] : memref<1x32xf32, #tpu.memory_space<vmem>>, vector<1x32xf32>
    %cst_31 = arith.constant dense<0.000000e+00> : vector<8xf32>
    %76 = vector.multi_reduction <add>, %73, %cst_31 [1] : vector<8x32xf32> to vector<8xf32>
    %77 = vector.shape_cast %76 : vector<8xf32> to vector<8x1xf32>
    %cst_32 = arith.constant 3.200000e+01 : f32
    %78 = vector.broadcast %cst_32 : f32 to vector<8x1xf32>
    %79 = arith.divf %77, %78 : vector<8x1xf32>
    %80 = vector.broadcast %79 : vector<8x1xf32> to vector<8x32xf32>
    %81 = arith.subf %73, %80 : vector<8x32xf32>
    %82 = arith.mulf %81, %81 : vector<8x32xf32>
    %cst_33 = arith.constant dense<0.000000e+00> : vector<8xf32>
    %83 = vector.multi_reduction <add>, %82, %cst_33 [1] : vector<8x32xf32> to vector<8xf32>
    %84 = vector.shape_cast %83 : vector<8xf32> to vector<8x1xf32>
    %cst_34 = arith.constant 3.200000e+01 : f32
    %85 = vector.broadcast %cst_34 : f32 to vector<8x1xf32>
    %86 = arith.divf %84, %85 : vector<8x1xf32>
    %87 = vector.broadcast %79 : vector<8x1xf32> to vector<8x32xf32>
    %88 = arith.subf %73, %87 : vector<8x32xf32>
    %cst_35 = arith.constant 9.99999974E-6 : f32
    %89 = vector.broadcast %cst_35 : f32 to vector<8x1xf32>
    %90 = arith.addf %86, %89 : vector<8x1xf32>
    %91 = math.rsqrt %90 : vector<8x1xf32>
    %92 = vector.broadcast %91 : vector<8x1xf32> to vector<8x32xf32>
    %93 = arith.mulf %88, %92 : vector<8x32xf32>
    %94 = vector.broadcast %74 : vector<1x32xf32> to vector<8x32xf32>
    %95 = arith.mulf %93, %94 : vector<8x32xf32>
    %96 = vector.broadcast %75 : vector<1x32xf32> to vector<8x32xf32>
    %97 = arith.addf %95, %96 : vector<8x32xf32>
    %98 = arith.truncf %97 : vector<8x32xf32> to vector<8x32xbf16>
    %c0_36 = arith.constant 0 : index
    %c0_37 = arith.constant 0 : index
    %99 = vector.load %arg10[%c0_36, %c0_37] : memref<32x128xbf16, #tpu.memory_space<vmem>>, vector<32x128xbf16>
    %cst_38 = arith.constant dense<0.000000e+00> : vector<8x128xf32>
    %100 = tpu.matmul %98, %99, %cst_38 {dimension_numbers = #tpu.dot_dimension_numbers<[1], [0], [0], [1], [0, 0, 1, 1], [], []>} : vector<8x32xbf16>, vector<32x128xbf16>, vector<8x128xf32> -> vector<8x128xf32>
    %c0_39 = arith.constant 0 : index
    %c0_40 = arith.constant 0 : index
    %101 = vector.load %arg11[%c0_39, %c0_40] : memref<1x128xf32, #tpu.memory_space<vmem>>, vector<1x128xf32>
    %102 = vector.broadcast %101 : vector<1x128xf32> to vector<8x128xf32>
    %103 = arith.addf %100, %102 : vector<8x128xf32>
    %cst_41 = arith.constant 5.000000e-01 : f32
    %104 = vector.broadcast %cst_41 : f32 to vector<8x128xf32>
    %105 = arith.mulf %104, %103 : vector<8x128xf32>
    %106 = arith.mulf %103, %103 : vector<8x128xf32>
    %107 = arith.mulf %103, %106 : vector<8x128xf32>
    %cst_42 = arith.constant 4.471500e-02 : f32
    %108 = vector.broadcast %cst_42 : f32 to vector<8x128xf32>
    %109 = arith.mulf %108, %107 : vector<8x128xf32>
    %110 = arith.addf %103, %109 : vector<8x128xf32>
    %cst_43 = arith.constant 0.797884583 : f32
    %111 = vector.broadcast %cst_43 : f32 to vector<8x128xf32>
    %112 = arith.mulf %111, %110 : vector<8x128xf32>
    %113 = math.tanh %112 : vector<8x128xf32>
    %cst_44 = arith.constant 1.000000e+00 : f32
    %114 = vector.broadcast %cst_44 : f32 to vector<8x128xf32>
    %115 = arith.addf %114, %113 : vector<8x128xf32>
    %116 = arith.mulf %105, %115 : vector<8x128xf32>
    %117 = arith.truncf %116 : vector<8x128xf32> to vector<8x128xbf16>
    %c0_45 = arith.constant 0 : index
    %c0_46 = arith.constant 0 : index
    %118 = vector.load %arg12[%c0_45, %c0_46] : memref<128x32xbf16, #tpu.memory_space<vmem>>, vector<128x32xbf16>
    %cst_47 = arith.constant dense<0.000000e+00> : vector<8x32xf32>
    %119 = tpu.matmul %117, %118, %cst_47 {dimension_numbers = #tpu.dot_dimension_numbers<[1], [0], [0], [1], [0, 0, 1, 1], [], []>} : vector<8x128xbf16>, vector<128x32xbf16>, vector<8x32xf32> -> vector<8x32xf32>
    %c0_48 = arith.constant 0 : index
    %c0_49 = arith.constant 0 : index
    %120 = vector.load %arg13[%c0_48, %c0_49] : memref<1x32xf32, #tpu.memory_space<vmem>>, vector<1x32xf32>
    %121 = vector.broadcast %120 : vector<1x32xf32> to vector<8x32xf32>
    %122 = arith.addf %119, %121 : vector<8x32xf32>
    %123 = arith.addf %73, %122 : vector<8x32xf32>
    %c0_50 = arith.constant 0 : index
    %c0_51 = arith.constant 0 : index
    %c0_52 = arith.constant 0 : index
    %124 = vector.load %arg14[%c0_50, %c0_51, %c0_52] : memref<1x8x32xf32, #tpu.memory_space<vmem>>, vector<1x8x32xf32>
    %125 = vector.shape_cast %124 : vector<1x8x32xf32> to vector<8x32xf32>
    %126 = vector.shape_cast %123 : vector<8x32xf32> to vector<1x8x32xf32>
    tpu.vector_store %arg14[%c0_50, %c0_51, %c0_52], %126 {strides = array<i32>} : memref<1x8x32xf32, #tpu.memory_space<vmem>>, vector<1x8x32xf32>,
    return
  }
  func.func @transform_0(%arg0: i32) -> (i32, i32, i32) {
    %c0_i32 = arith.constant 0 : i32
    %c0_i32_0 = arith.constant 0 : i32
    %c0_i32_1 = arith.constant 0 : i32
    return %arg0, %c0_i32, %c0_i32_0 : i32, i32, i32
  }
  func.func @transform_1(%arg0: i32) -> (i32, i32) {
    %c0_i32 = arith.constant 0 : i32
    %c0_i32_0 = arith.constant 0 : i32
    %c0_i32_1 = arith.constant 0 : i32
    return %c0_i32, %c0_i32_0 : i32, i32
  }
  func.func @transform_2(%arg0: i32) -> (i32, i32) {
    %c0_i32 = arith.constant 0 : i32
    %c0_i32_0 = arith.constant 0 : i32
    %c0_i32_1 = arith.constant 0 : i32
    return %c0_i32, %c0_i32_0 : i32, i32
  }
  func.func @transform_3(%arg0: i32) -> (i32, i32) {
    %c0_i32 = arith.constant 0 : i32
    %c0_i32_0 = arith.constant 0 : i32
    %c0_i32_1 = arith.constant 0 : i32
    return %c0_i32, %c0_i32_0 : i32, i32
  }
  func.func @transform_4(%arg0: i32) -> (i32, i32) {
    %c0_i32 = arith.constant 0 : i32
    %c0_i32_0 = arith.constant 0 : i32
    %c0_i32_1 = arith.constant 0 : i32
    return %c0_i32, %c0_i32_0 : i32, i32
  }
  func.func @transform_5(%arg0: i32) -> (i32, i32) {
    %c0_i32 = arith.constant 0 : i32
    %c0_i32_0 = arith.constant 0 : i32
    %c0_i32_1 = arith.constant 0 : i32
    return %c0_i32, %c0_i32_0 : i32, i32
  }
  func.func @transform_6(%arg0: i32) -> (i32, i32) {
    %c0_i32 = arith.constant 0 : i32
    %c0_i32_0 = arith.constant 0 : i32
    %c0_i32_1 = arith.constant 0 : i32
    return %c0_i32, %c0_i32_0 : i32, i32
  }
  func.func @transform_7(%arg0: i32) -> (i32, i32) {
    %c0_i32 = arith.constant 0 : i32
    %c0_i32_0 = arith.constant 0 : i32
    %c0_i32_1 = arith.constant 0 : i32
    return %c0_i32, %c0_i32_0 : i32, i32
  }
  func.func @transform_8(%arg0: i32) -> (i32, i32) {
    %c0_i32 = arith.constant 0 : i32
    %c0_i32_0 = arith.constant 0 : i32
    %c0_i32_1 = arith.constant 0 : i32
    return %c0_i32, %c0_i32_0 : i32, i32
  }
  func.func @transform_9(%arg0: i32) -> (i32, i32) {
    %c0_i32 = arith.constant 0 : i32
    %c0_i32_0 = arith.constant 0 : i32
    %c0_i32_1 = arith.constant 0 : i32
    return %c0_i32, %c0_i32_0 : i32, i32
  }
  func.func @transform_10(%arg0: i32) -> (i32, i32) {
    %c0_i32 = arith.constant 0 : i32
    %c0_i32_0 = arith.constant 0 : i32
    %c0_i32_1 = arith.constant 0 : i32
    return %c0_i32, %c0_i32_0 : i32, i32
  }
  func.func @transform_11(%arg0: i32) -> (i32, i32) {
    %c0_i32 = arith.constant 0 : i32
    %c0_i32_0 = arith.constant 0 : i32
    %c0_i32_1 = arith.constant 0 : i32
    return %c0_i32, %c0_i32_0 : i32, i32
  }
  func.func @transform_12(%arg0: i32) -> (i32, i32) {
    %c0_i32 = arith.constant 0 : i32
    %c0_i32_0 = arith.constant 0 : i32
    %c0_i32_1 = arith.constant 0 : i32
    return %c0_i32, %c0_i32_0 : i32, i32
  }
  func.func @transform_13(%arg0: i32) -> (i32, i32, i32) {
    %c0_i32 = arith.constant 0 : i32
    %c0_i32_0 = arith.constant 0 : i32
    %c0_i32_1 = arith.constant 0 : i32
    return %arg0, %c0_i32, %c0_i32_0 : i32, i32, i32
  }
}

</mosaic_0001>

<bundles_post_ra>
// kernel: gpt_forward.5
= control target key start
LH: loop header
LB: loop body
LE: loop exit
PB: predicated region body
PF: predicated region fallthrough
CT: control target
= control target key end

     0   :  { %9 = vsyncpa [#allocation3], 0  ;;  %s741_s0 = inlined_call_operand.vmem [shape: f32[2,8,32], index: 0, kind: input, shape index: {}]   ;;  %s742_s1 = inlined_call_operand.vmem [shape: f32[1,32], index: 1, kind: input, shape index: {}]   ;;  %s743_s2 = inlined_call_operand.vmem [shape: f32[1,32], index: 2, kind: input, shape index: {}]   ;;  %s744_s3 = inlined_call_operand.vmem [shape: bf16[32,64], index: 3, kind: input, shape index: {}]   ;;  %s745_s4 = inlined_call_operand.hbm [shape: f32[2,8,64], index: 4, kind: output, shape index: {}]  }
   0x1   :  { %11 = vsyncpa [#allocation3 + $0x1], 0  ;;  %s614_s15 = smov 0   ;;  %s616_s16 = smov 0  }
   0x2   :  { %s618_s17 = smov 0   ;;  %s620_s18 = smov 0  }
   0x3   :  { %s622_s19 = smov 0   ;;  %s624_s20 = smov 0  }
   0x4 LB: > { %s417_s21 = sadd.s32 4294967295, %s584_s20   ;;  %s418_s22 = sadd.s32 4294967294, %s584_s20   ;;  %s584_s20 = sphi %s624_s20, %s17_s20   ;;  %s580_s19 = sphi %s622_s19, %s752_s19   ;;  %s576_s18 = sphi %s620_s18, %s751_s18   ;;  %s572_s17 = sphi %s618_s17, %s750_s17   ;;  %s568_s16 = sphi %s616_s16, %s749_s16   ;;  %s564_s15 = sphi %s614_s15, %s748_s15  }
   0x5   : > { %s29_s23 = sadd.s32 1, %s580_s19  ;;  %s132_s24 = sadd.s32 1, %s572_s17 }
   0x6   : > { %p31_p0 = scmp.ge.s32.totalorder %s29_s23, 2  ;;  %p142_p1 = scmp.ne.s32.totalorder %s572_s17, %s568_s16 }
   0x7   : > { %p143_p2 = scmp.eq.s32.totalorder %s417_s21, 1  ;;  %p148_p3 = scmp.ne.s32.totalorder %s568_s16, %s564_s15 }
   0x8   : > { %s754_s23 = smov (%p31_p0, %s29_s23), 0  ;;  %p149_p5 = scmp.eq.s32.totalorder %s418_s22, 1 }
   0x9   : > { %p654_p4 = por %p143_p2, %p142_p1  ;;  %s127_s26 = ssub.s32 %s580_s19, %s754_s23 }
   0xa   : > { %p422_p6 = scmp.ge.s32.totalorder %s584_s20, 1  ;;  %p130_p7 = scmp.eq.s32.totalorder %s127_s26, 0 }
   0xb   : > { %p661_p8 = por %p149_p5, %p148_p3  ;;  %p187_p9 = scmp.lt.s32.totalorder %s584_s20, 3 }
   0xc   : > { %s667_s28 = scalar_select %p130_p7, %s572_s17, %s132_s24  }
   0xd   : > { %p188_p10 = pnand %p422_p6, %p187_p9 }
   0xe   : > { %p216_p11 = scmp.lt.s32.totalorder (!%p188_p10), %s576_s18, 1  ;;  %vm228_vm0 = vcmask (!%p188_p10), 261120   ;;  %v502_v7 = vld [vmem:[%s744_s3] sm:$0xff] (!%p188_p10)   ;;  %v586_v8 = vmov (!%p188_p10), 0.0   ;;  %v503_v9 = vld [vmem:[%s744_s3 + $0x8] sm:$0xff] (!%p188_p10)   ;;  %vm587_vm1 = vmmov (!%p188_p10), 0  }
   0xf   : > { %191 = sbr.rel (%p188_p10) target bundleno = 569 (0x239), region = 36  ;;  %437 = vmatprep.subr.bf16.mxu0 (!%p188_p10), %v586_v8  ;;  %441 = vmatprep.mubr.msk.bf16.mxu0 (!%p188_p10), %vm587_vm1, %v586_v8  ;;  %v425_v14 = vld [vmem:[%s742_s1] ss:$0 sm:$0xff] (!%p188_p10)  ;;  %s213_s22 = sand.u32 (!%p188_p10), 1, %s568_s16   ;;  %vm317_vm2 = vcmask (!%p188_p10), 523264  }
  0x10   : > { %438 = vmatpush3.bf16.msra.mxu0 (!%p188_p10), %v502_v7  ;;  %v426_v16 = vld [vmem:[%s743_s2] ss:$0 sm:$0xff] (!%p188_p10)  ;;  %s423_s24 = sshll.u32 (!%p188_p10), %s213_s22, 3  ;;  %s431_s26 = sshll.u32 (!%p188_p10), %s576_s18, 7 }
  0x11   : > { %439 = vmatprep.subr.bf16.mxu0 (!%p188_p10), %v586_v8  ;;  %s320_s8 = scalar_lea.sflag (!%p188_p10), [#allocation3], %s213_s22 }
  0x14   : > { %440 = vmatpush3.bf16.msra.mxu0 (!%p188_p10), %v503_v9 }
  0x16   : > { %s217_s29 = scalar_select %p216_p11, %s576_s18, 1 }
  0x17   : > { %s588_s18 = smov [#allocation2]  }
  0x18   : > { %s424_s30 = sshll.u32 %s217_s29, 3  ;;  %s215_s29 = scalar_lea.vmem [#allocation2], %s423_s24 }
  0x19   : > { %s219_s7 = scalar_lea.vmem %s741_s0, %s424_s30  ;;  %s334_s30 = sshll.u32 %s215_s29, 4  ;;  %s696_s30 = int_to_ptr.vmem [resolvable:$true] %s334_s30 }
  0x1a   : > { %v225_v0 = vld [vmem:[%s219_s7] sm:$0xff]  ;;  %s694_s7 = scalar_lea.hbm %s745_s4, %s431_s26  ;;  %s506_s9 = scalar_lea.vmem %s696_s30, 128 }
  0x1b   : > { %v229_v1 = vsel %vm228_vm0, %v225_v0, 0.0  ;;  %p507_p12 = scmp.ne.s32.totalorder %s696_s30, %s506_s9  ;;  %s510_s10 = sshll.u32 %s588_s18, 4  ;;  %s511_s10 = int_to_ptr.vmem [resolvable:$false] %s510_s10 }
  0x1c   : > { %230 = vadd.xlane.f32.xlu0 %v229_v1  ;;  %s512_s11 = scalar_lea.vmem %s511_s10, 256  ;;  %p513_p1 = scmp.lt.s32.totalorder %s696_s30, %s511_s10 }
  0x1d   : > { %p508_p13 = pnand %p507_p12, %p654_p4  ;;  %p514_p2 = scmp.lt.s32.totalorder %s512_s11, %s506_s9 }
  0x1f   : > { %p509_p0 = pneg %p508_p13  ;;  %p515_p3 = por %p514_p2, %p513_p1 }
  0x21   : > { %p516_p5 = pnand %p515_p3, %p509_p0 }
  0xa9   : > { %v231_v2 = vpop.xlane.xlu0 %230 }
  0xaa   : > { %v233_v3 = vmul.f32 0.03125, %v231_v2 }
  0xac   : > { %v234_v4 = vsub.f32 %v225_v0, %v233_v3 }
  0xae   : > { %v235_v5 = vmul.f32 %v234_v4, %v234_v4 }
  0xb0   : > { %v236_v6 = vsel %vm228_vm0, %v235_v5, 0.0 }
  0xb1   : > { %237 = vadd.xlane.f32.xlu0 %v236_v6 }
 0x13e   : > { %v238_v10 = vpop.xlane.xlu0 %237 }
 0x13f   : > { %v239_v11 = vmul.f32 0.03125, %v238_v10 }
 0x141   : > { %v240_v12 = vadd.f32 1e-05, %v239_v11 }
 0x143   : > { %504 = vrsqrt.f32 %v240_v12 }
 0x14d   : > { %v505_v13 = vpop.eup %504 }
 0x14e   : > { %v242_v15 = vmul.f32 %v505_v13, %v234_v4 }
 0x150   : > { %v249_v17 = vmul.f32 %v425_v14, %v242_v15 }
 0x152   : > { %v256_v18 = vadd.f32 %v426_v16, %v249_v17 }
 0x154   : > { %v257_v19 = vpack.c.bf16 %v256_v18, %v256_v18 }
 0x156   : > { %442 = vmatmul.mubr.msk.bf16.vlgmr.msra.gmra.mrb[0].mxu0 %vm228_vm0, %v257_v19 }
 0x229   : > { %v311_v20 = vpop.f32.mrb[0].mxu0 }
 0x22a   : > { %318 = vst.msk [vmem:[%s215_s29] sm:$0xff] %vm317_vm2, %v311_v20  ;;  %v443_v21 = vpop.f32.mrb[1].mxu0 }
 0x22b   : > { %v314_v22 = vpop.f32.mrb[2].mxu0 }
 0x22c   : > { %519 = shalt.err (!%p516_p5)
}
 0x22d   : > { %s520_s12 = scalar_lea.hbm %s694_s7, 128  ;;  %s524_s21 = scalar_lea.hbm %s745_s4, 256 }
 0x22e   : > { %p521_p6 = scmp.ne.s32.totalorder %s694_s7, %s520_s12  ;;  %p525_p10 = scmp.lt.u32.totalorder %s694_s7, %s745_s4 }
 0x22f   : > { %p526_p11 = scmp.lt.u32.totalorder %s524_s21, %s520_s12  ;;  %p528_p13 = scmp.lt.u32.totalorder %s520_s12, %s694_s7 }
 0x230   : > { %p522_p7 = pnand %p521_p6, %p654_p4 }
 0x231   : > { %p527_p12 = por %p526_p11, %p525_p10 }
 0x232   : > { %p523_p9 = pneg %p522_p7 }
 0x233   : > { %p529_p0 = por %p528_p13, %p527_p12 }
 0x235   : > { %p530_p1 = pnand %p529_p0, %p523_p9 }
 0x237   : > { %533 = shalt.err (!%p530_p1)
}
 0x238   : > { %445 = dma.vmem_to_hbm [thread:$0]  (%p654_p4), %s696_s30, 128, %s694_s7, %s320_s8   ;;  %v444_v23 = vpop.f32.mrb[3].mxu0 }
 0x239 PF: > { %p451_p2 = scmp.ge.s32.totalorder %s584_s20, 2  ;;  %s346_s26 = sand.u32 1, %s564_s15  }
 0x23a   : > { %s347_s29 = scalar_lea.sflag [#allocation3], %s346_s26 }
 0x23b   : > { %p448_p3 = pnand %p451_p2, %p661_p8 }
 0x23d   : > { %559 = dma.done.wait (!%p448_p3), %s347_s29, 128  }
 0x23e   : > { %561 = vsyncadd (!%p448_p3), %s347_s29, 4294967168  ;;  %s17_s20 = sadd.s32 1, %s584_s20   ;;  %s748_s15 = smov %s568_s16 }
 0x23f   : > { %p14_p5 = scmp.ge.s32.totalorder %s17_s20, 4   ;;  %s749_s16 = smov %s572_s17 }
 0x240   : > { %s750_s17 = smov %s667_s28  ;;  %s751_s18 = smov %s580_s19 }
 0x241   : > { %s752_s19 = smov %s754_s23  ;;  %16 = sbr.rel (!%p14_p5) target bundleno = 4 (0x4), region = 74 }
 0x248   :  { %352 = vsyncpa [#allocation3], 1 }
 0x249   :  { %354 = vsyncpa [#allocation3 + $0x1], 1 }

// kernel: gpt_forward.3
= control target key start
LH: loop header
LB: loop body
LE: loop exit
PB: predicated region body
PF: predicated region fallthrough
CT: control target
= control target key end

     0   :  { %s3156_s25 = smov 0   ;;  %s3486_s0 = inlined_call_operand.vmem [shape: f32[2,8,32], index: 0, kind: input, shape index: {}, may-alias: {0,13}]   ;;  %s3487_s1 = inlined_call_operand.vmem [shape: f32[1,32], index: 1, kind: input, shape index: {}]   ;;  %s3488_s2 = inlined_call_operand.vmem [shape: f32[1,32], index: 2, kind: input, shape index: {}]   ;;  %s3489_s3 = inlined_call_operand.vmem [shape: bf16[32,96], index: 3, kind: input, shape index: {}]   ;;  %s3490_s4 = inlined_call_operand.vmem [shape: f32[1,96], index: 4, kind: input, shape index: {}]   ;;  %s3491_s5 = inlined_call_operand.vmem [shape: bf16[32,32], index: 5, kind: input, shape index: {}]   ;;  %s3492_s6 = inlined_call_operand.vmem [shape: f32[1,32], index: 6, kind: input, shape index: {}]   ;;  %s3493_s7 = inlined_call_operand.vmem [shape: f32[1,32], index: 7, kind: input, shape index: {}]   ;;  %s3494_s8 = inlined_call_operand.vmem [shape: f32[1,32], index: 8, kind: input, shape index: {}]   ;;  %s3495_s9 = inlined_call_operand.vmem [shape: bf16[32,128], index: 9, kind: input, shape index: {}]   ;;  %s3496_s10 = inlined_call_operand.vmem [shape: f32[1,128], index: 10, kind: input, shape index: {}]   ;;  %s3497_s11 = inlined_call_operand.vmem [shape: bf16[128,32], index: 11, kind: input, shape index: {}]   ;;  %s3498_s12 = inlined_call_operand.vmem [shape: f32[1,32], index: 12, kind: input, shape index: {}]   ;;  %s3499_s13 = inlined_call_operand.vmem [shape: f32[2,8,32], index: 13, kind: output, shape index: {}, may-alias: {0,13}]  }
   0x1 LB: > { %s2883_s26 = sadd.s32 4294967295, %s3074_s25   ;;  %p2887_p0 = scmp.ge.s32.totalorder %s3074_s25, 1  ;;  %s3074_s25 = sphi %s3156_s25, %s23_s25  }
   0x2   : > { %p386_p1 = scmp.lt.s32.totalorder %s3074_s25, 3 }
   0x4   : > { %p387_p2 = pnand %p2887_p0, %p386_p1 }
   0x5   : > { %p428_p3 = scmp.lt.s32.totalorder (!%p387_p2), %s2883_s26, 1  ;;  %vm440_vm0 = vcmask (!%p387_p2), 261120   ;;  %v3039_v7 = vld [vmem:[%s3489_s3] sm:$0xff] (!%p387_p2)   ;;  %v3076_v8 = vmov (!%p387_p2), 0.0   ;;  %vm3077_vm1 = vmmov (!%p387_p2), 0   ;;  %v3040_v9 = vld [vmem:[%s3489_s3 + $0x8] sm:$0xff] (!%p387_p2)   ;;  %v545_v29 = vlaneseq (!%p387_p2) }
   0x6   : > { %390 = sbr.rel (%p387_p2) target bundleno = 3130 (0xc3a), region = 72  ;;  %2953 = vmatprep.subr.bf16.mxu1 (!%p387_p2), %v3076_v8  ;;  %2957 = vmatprep.mubr.msk.bf16.mxu1 (!%p387_p2), %vm3077_vm1, %v3076_v8  ;;  %v2890_v14 = vld [vmem:[%s3487_s1] ss:$0 sm:$0xff] (!%p387_p2)  ;;  %s3078_s24 = smov (!%p387_p2), 112   ;;  %v3080_v27 = vmov (!%p387_p2), 1983009808  }
   0x7   : > { %2954 = vmatpush3.bf16.msra.mxu1 (!%p387_p2), %v3039_v7  ;;  %2973 = vmatprep.subr.bf16.mxu0 (!%p387_p2), %v3076_v8  ;;  %v2891_v16 = vld [vmem:[%s3488_s2] ss:$0 sm:$0xff] (!%p387_p2)  ;;  %s3079_s28 = smov (!%p387_p2), 96   ;;  %v543_v28 = vunpack.c.l.s4 (!%p387_p2), %v3080_v27  ;;  %v3081_v30 = vmov (!%p387_p2), 1934713408   ;;  %v3212_v33 = vshrl.u32 (!%p387_p2), %v545_v29, 7 }
   0x8   : > { %2955 = vmatprep.subr.bf16.mxu1 (!%p387_p2), %v3076_v8  ;;  %2975 = vmatprep.mubr.msk.bf16.mxu0 (!%p387_p2), %vm3077_vm1, %v3076_v8  ;;  %v2892_v20 = vld [vmem:[%s3490_s4] ss:$0 sm:$0xff] (!%p387_p2)  ;;  %v574_v31 = vunpack.c.l.s4 (!%p387_p2), %v3081_v30  ;;  %s3083_s29 = smov (!%p387_p2), 64   ;;  %vm1496_vm2 = vcmask (!%p387_p2), 130048   ;;  %vm1583_vm4 = vcmask (!%p387_p2), 64512   ;;  %s3085_s18 = smov (!%p387_p2), 16  }
   0x9   : > { %v544_v32 = vunpack.c.0.s8 (!%p387_p2), %v543_v28 }
   0xa   : > { %v575_v35 = vunpack.c.0.s8 (!%p387_p2), %v574_v31 }
   0xb   : > { %2956 = vmatpush3.bf16.msra.mxu1 (!%p387_p2), %v3040_v9  ;;  %v3215_v36 = vsub.s32 (!%p387_p2), %v544_v32, %v3212_v33 }
   0xc   : > { %2961 = vmatprep.subr.bf16.mxu1 (!%p387_p2), %v3076_v8  ;;  %v3222_v42 = vsub.s32 (!%p387_p2), %v575_v35, %v3212_v33 }
   0xd   : > { %s3501_s26 = smov (!%p428_p3, %s2883_s26), 1 }
   0xe   : > { %s2888_s27 = sshll.u32 %s3501_s26, 3 }
   0xf   : > { %s3172_s30 = scalar_lea.vmem %s3486_s0, %s2888_s27 }
  0x10   : > { %v437_v0 = vld [vmem:[%s3172_s30] sm:$0xff] }
  0x11   : > { %v441_v1 = vsel %vm440_vm0, %v437_v0, 0.0 }
  0x12   : > { %442 = vadd.xlane.f32.xlu0 %v441_v1 }
  0x9f   : > { %v443_v2 = vpop.xlane.xlu0 %442 }
  0xa0   : > { %v445_v3 = vmul.f32 0.03125, %v443_v2 }
  0xa2   : > { %v446_v4 = vsub.f32 %v437_v0, %v445_v3 }
  0xa4   : > { %v447_v5 = vmul.f32 %v446_v4, %v446_v4 }
  0xa6   : > { %v448_v6 = vsel %vm440_vm0, %v447_v5, 0.0 }
  0xa7   : > { %449 = vadd.xlane.f32.xlu0 %v448_v6 }
 0x134   : > { %v450_v10 = vpop.xlane.xlu0 %449 }
 0x135   : > { %v451_v11 = vmul.f32 0.03125, %v450_v10 }
 0x137   : > { %v452_v12 = vadd.f32 1e-05, %v451_v11 }
 0x139   : > { %3053 = vrsqrt.f32 %v452_v12 }
 0x143   : > { %v3054_v13 = vpop.eup %3053 }
 0x144   : > { %v454_v15 = vmul.f32 %v3054_v13, %v446_v4 }
 0x146   : > { %v461_v17 = vmul.f32 %v2890_v14, %v454_v15 }
 0x148   : > { %v468_v18 = vadd.f32 %v2891_v16, %v461_v17 }
 0x14a   : > { %v469_v19 = vpack.c.bf16 %v468_v18, %v468_v18 }
 0x14c   : > { %2958 = vmatmul.mubr.msk.bf16.vlgmr.msra.gmra.mrb[0].mxu1 %vm440_vm0, %v469_v19 }
 0x14d   : > { %2963 = vmatprep.mubr.msk.bf16.mxu1 %vm3077_vm1, %v3076_v8 }
 0x21f   : > { %v530_v21 = vpop.f32.mrb[0].mxu1 }
 0x220   : > { %v3203_v22 = vadd.f32 %v2892_v20, %v530_v21  ;;  %v2959_v23 = vpop.f32.mrb[1].mxu1 }
 0x221   : > { %v533_v24 = vpop.f32.mrb[2].mxu1 }
 0x222   : > { %616 = vrot.lane.b32.xlu1 %v3203_v22, %s3078_s24  ;;  %v2960_v25 = vpop.f32.mrb[3].mxu1  ;;  %v3235_v1 = vmul.f32 0.25, %v3203_v22 }
 0x226   : > { %618 = vrot.lane.b32.xlu1 %v3203_v22, %s3079_s28 }
 0x294   : > { %v3208_v26 = vpop.permute.xlu1 %616 }
 0x295   : > { %620 = vrot.lane.b32.xlu0 %v3208_v26, %s3079_s28 }
 0x298   : > { %v619_v34 = vpop.permute.xlu1 %618 }
 0x299   : > { %v624_v37 = vcombine.high %v619_v34, %v3076_v8  ;;  %v631_v39 = vrot.slane %v619_v34, %v3215_v36 }
 0x29b   : > { %v638_v43 = vrot.slane %v624_v37, %v3215_v36 }
 0x307   : > { %v621_v38 = vpop.permute.xlu0 %620 }
 0x308   : > { %v639_v40 = vcombine.high %v621_v38, %v3076_v8  ;;  %v646_v41 = vrot.slane %v621_v38, %v3215_v36 }
 0x30a   : > { %v653_v44 = vrot.slane %v639_v40, %v3215_v36  ;;  %v654_v45 = vcombine.low %v631_v39, %v646_v41  ;;  %v655_v46 = vcombine.high %v631_v39, %v646_v41 }
 0x30c   : > { %v671_v47 = vcombine.high %v638_v43, %v653_v44  ;;  %v662_v48 = vrot.slane %v654_v45, %v3222_v42  ;;  %v669_v51 = vrot.slane %v655_v46, %v3222_v42  ;;  %v670_v57 = vcombine.low %v638_v43, %v653_v44 }
 0x30e   : > { %v690_v49 = vpack.c.bf16 %v662_v48, %v662_v48  ;;  %v686_v50 = vcombine.high %v662_v48, %v3076_v8  ;;  %v685_v52 = vrot.slane %v671_v47, %v3222_v42  ;;  %v692_v55 = vpack.c.bf16 %v669_v51, %v669_v51 }
 0x30f   : > { %v687_v56 = vcombine.high %v669_v51, %v3076_v8  ;;  %v678_v60 = vrot.slane %v670_v57, %v3222_v42 }
 0x310   : > { %838 = vxpose.xlu1.c.b16.start.end [1/1] (short) (narrow) %v690_v49, 16  ;;  %v691_v53 = vpack.c.bf16 %v686_v50, %v686_v50  ;;  %v689_v54 = vcombine.high %v685_v52, %v3076_v8  ;;  %v696_v0 = vpack.c.bf16 %v685_v52, %v685_v52 }
 0x311   : > { %v693_v59 = vpack.c.bf16 %v687_v56, %v687_v56  ;;  %v694_v61 = vpack.c.bf16 %v678_v60, %v678_v60  ;;  %v688_v62 = vcombine.high %v678_v60, %v3076_v8 }
 0x312   : > { %854 = vxpose.xlu0.c.b16.start.end [1/1] (short) (narrow) %v691_v53, 16  ;;  %v697_v58 = vpack.c.bf16 %v689_v54, %v689_v54 }
 0x313   : > { %v695_v63 = vpack.c.bf16 %v688_v62, %v688_v62  ;;  %v3082_v62 = vmov 0  }
 0x314   : > { %870 = vxpose.xlu1.c.b16.start.end [1/1] (short) (narrow) %v692_v55, 16 }
 0x316   : > { %950 = vxpose.xlu0.c.b16.start.end [1/1] (short) (narrow) %v697_v58, 16 }
 0x318   : > { %886 = vxpose.xlu1.c.b16.start.end [1/1] (short) (narrow) %v693_v59, 16 }
 0x31c   : > { %902 = vxpose.xlu1.c.b16.start.end [1/1] (short) (narrow) %v694_v61, 16 }
 0x320   : > { %918 = vxpose.xlu1.c.b16.start.end [1/1] (short) (narrow) %v695_v63, 16 }
 0x324   : > { %934 = vxpose.xlu1.c.b16.start.end [1/1] (short) (narrow) %v696_v0, 16 }
 0x328   : > { %538 = vrot.lane.b32.xlu1 %v3235_v1, %s3078_s24 }
 0x376   : > { %v846_v2 = vpop.trf.xlu1 }
 0x377   : > { %v970_v14 = vshrl.u32 %v846_v2, 16 }
 0x378   : > { %v862_v5 = vpop.trf.xlu0 }
 0x379   : > { %v971_v7 = vshrl.u32 %v862_v5, 16  ;;  %v968_v15 = vpack.i.b16 %v862_v5, %v846_v2 }
 0x37a   : > { %v878_v3 = vpop.trf.xlu1 }
 0x37b   : > { %v972_v19 = vpack.i.b16 %v971_v7, %v970_v14  ;;  %v978_v23 = vshrl.u32 %v878_v3, 16 }
 0x37c   : > { %v958_v10 = vpop.trf.xlu0 }
 0x37d   : > { %v995_v18 = vshrl.u32 %v958_v10, 16 }
 0x37e   : > { %v894_v4 = vpop.trf.xlu1 }
 0x37f   : > { %v979_v16 = vshrl.u32 %v894_v4, 16  ;;  %v976_v24 = vpack.i.b16 %v894_v4, %v878_v3 }
 0x381   : > { %v980_v28 = vpack.i.b16 %v979_v16, %v978_v23 }
 0x382   : > { %v910_v6 = vpop.trf.xlu1 }
 0x383   : > { %v986_v11 = vshrl.u32 %v910_v6, 16 }
 0x386   : > { %v926_v9 = vpop.trf.xlu1 }
 0x387   : > { %v984_v12 = vpack.i.b16 %v926_v9, %v910_v6  ;;  %v987_v13 = vshrl.u32 %v926_v9, 16 }
 0x389   : > { %v988_v17 = vpack.i.b16 %v987_v13, %v986_v11  ;;  %v998_v20 = vcombine.low %v968_v15, %v984_v12  ;;  %v999_v41 = vcombine.high %v968_v15, %v984_v12 }
 0x38a   : > { %v942_v21 = vpop.trf.xlu1 }
 0x38b   : > { %v992_v25 = vpack.i.b16 %v958_v10, %v942_v21  ;;  %v994_v27 = vshrl.u32 %v942_v21, 16  ;;  %v1066_v30 = vcombine.low %v972_v19, %v988_v17  ;;  %v1067_v34 = vcombine.high %v972_v19, %v988_v17 }
 0x38c   : > { %v1006_v35 = vrot.slane %v998_v20, %v3215_v36  ;;  %v1013_v54 = vrot.slane %v999_v41, %v3215_v36  ;;  %v541_v20 = vcombine.high %v3235_v1, %v3076_v8 }
 0x38d   : > { %v996_v31 = vpack.i.b16 %v995_v18, %v994_v27  ;;  %v1014_v32 = vcombine.low %v976_v24, %v992_v25  ;;  %v1015_v37 = vcombine.high %v976_v24, %v992_v25  ;;  %v1074_v43 = vrot.slane %v1066_v30, %v3215_v36 }
 0x38e   : > { %v1081_v47 = vrot.slane %v1067_v34, %v3215_v36  ;;  %v555_v25 = vrot.slane %v541_v20, %v3215_v36 }
 0x38f   : > { %v1082_v38 = vcombine.low %v980_v28, %v996_v31  ;;  %v1083_v39 = vcombine.high %v980_v28, %v996_v31  ;;  %v1022_v40 = vrot.slane %v1014_v32, %v3215_v36  ;;  %v1029_v51 = vrot.slane %v1015_v37, %v3215_v36 }
 0x390   : > { %v548_v28 = vrot.slane %v3235_v1, %v3215_v36 }
 0x391   : > { %v1090_v44 = vrot.slane %v1082_v38, %v3215_v36  ;;  %v1030_v45 = vcombine.low %v1006_v35, %v1022_v40  ;;  %v1097_v46 = vrot.slane %v1083_v39, %v3215_v36  ;;  %v1031_v50 = vcombine.high %v1006_v35, %v1022_v40 }
 0x392   : > { %v1046_v57 = vcombine.low %v1013_v54, %v1029_v51  ;;  %v1047_v61 = vcombine.high %v1013_v54, %v1029_v51 }
 0x393   : > { %v1038_v48 = vrot.slane %v1030_v45, %v3222_v42  ;;  %v1098_v49 = vcombine.low %v1074_v43, %v1090_v44  ;;  %v1115_v53 = vcombine.high %v1081_v47, %v1097_v46  ;;  %v1114_v55 = vcombine.low %v1081_v47, %v1097_v46 }
 0x394   : > { %v1045_v56 = vrot.slane %v1031_v50, %v3222_v42  ;;  %v1054_v60 = vrot.slane %v1046_v57, %v3222_v42  ;;  %v1061_v0 = vrot.slane %v1047_v61, %v3222_v42  ;;  %v1099_v4 = vcombine.high %v1074_v43, %v1090_v44 }
 0x395   : > { %1134 = vxpose.xlu0.c.b16.start.end [1/1] (short) (narrow) %v1038_v48, 16  ;;  %v1106_v52 = vrot.slane %v1098_v49, %v3222_v42  ;;  %v1129_v58 = vrot.slane %v1115_v53, %v3222_v42  ;;  %v1122_v59 = vrot.slane %v1114_v55, %v3222_v42  ;;  %v1062_v3 = vcombine.high %v1038_v48, %v3082_v62 }
 0x396   : > { %v1113_v5 = vrot.slane %v1099_v4, %v3222_v42  ;;  %v1063_v6 = vcombine.high %v1045_v56, %v3082_v62  ;;  %v1064_v7 = vcombine.high %v1054_v60, %v3082_v62  ;;  %v1065_v11 = vcombine.high %v1061_v0, %v3082_v62 }
 0x397   : > { %1150 = vxpose.xlu1.c.b16.start.end [1/1] (short) (narrow) %v1106_v52, 16  ;;  %v1132_v63 = vcombine.high %v1122_v59, %v3082_v62  ;;  %v1133_v2 = vcombine.high %v1129_v58, %v3082_v62  ;;  %v1130_v9 = vcombine.high %v1106_v52, %v3082_v62 }
 0x398   : > { %v1131_v10 = vcombine.high %v1113_v5, %v3082_v62 }
 0x399   : > { %1198 = vxpose.xlu0.c.b16.start.end [1/1] (short) (narrow) %v1045_v56, 16 }
 0x39a   : > { %v539_v15 = vpop.permute.xlu1 %538 }
 0x39b   : > { %1342 = vxpose.xlu1.c.b16.start.end [1/1] (short) (narrow) %v1129_v58, 16  ;;  %v556_v19 = vcombine.high %v539_v15, %v3076_v8 }
 0x39d   : > { %1262 = vxpose.xlu0.c.b16.start.end [1/1] (short) (narrow) %v1054_v60, 16  ;;  %v570_v24 = vrot.slane %v556_v19, %v3215_v36 }
 0x39f   : > { %1310 = vxpose.xlu1.c.b16.start.end [1/1] (short) (narrow) %v1132_v63, 16  ;;  %v587_v30 = vcombine.low %v555_v25, %v570_v24  ;;  %v588_v31 = vcombine.high %v555_v25, %v570_v24 }
 0x3a1   : > { %1326 = vxpose.xlu0.c.b16.start.end [1/1] (short) (narrow) %v1061_v0, 16  ;;  %v595_v38 = vrot.slane %v587_v30, %v3222_v42  ;;  %v602_v39 = vrot.slane %v588_v31, %v3222_v42 }
 0x3a3   : > { %1374 = vxpose.xlu1.c.b16.start.end [1/1] (short) (narrow) %v1133_v2, 16  ;;  %v605_v45 = vcombine.high %v595_v38, %v3076_v8  ;;  %v606_v1 = vcombine.high %v602_v39, %v3076_v8 }
 0x3a5   : > { %1166 = vxpose.xlu0.c.b16.start.end [1/1] (short) (narrow) %v1062_v3, 16 }
 0x3a7   : > { %700 = vrot.lane.b32.xlu1 %v3208_v26, %s3083_s29 }
 0x3a9   : > { %1214 = vxpose.xlu0.c.b16.start.end [1/1] (short) (narrow) %v1113_v5, 16 }
 0x3ad   : > { %1230 = vxpose.xlu0.c.b16.start.end [1/1] (short) (narrow) %v1063_v6, 16 }
 0x3b1   : > { %1278 = vxpose.xlu0.c.b16.start.end [1/1] (short) (narrow) %v1122_v59, 16 }
 0x3b5   : > { %1294 = vxpose.xlu0.c.b16.start.end [1/1] (short) (narrow) %v1064_v7, 16 }
 0x3b9   : > { %1182 = vxpose.xlu0.c.b16.start.end [1/1] (short) (narrow) %v1130_v9, 16 }
 0x3bd   : > { %1246 = vxpose.xlu0.c.b16.start.end [1/1] (short) (narrow) %v1131_v10, 16 }
 0x3c1   : > { %1358 = vxpose.xlu0.c.b16.start.end [1/1] (short) (narrow) %v1065_v11, 16 }
 0x3ca   : > { %698 = vrot.lane.b32.xlu0 %v3203_v22, %s3083_s29  ;;  %v563_v22 = vrot.slane %v539_v15, %v3215_v36 }
 0x3cc   : > { %v571_v34 = vcombine.low %v548_v28, %v563_v22  ;;  %v572_v35 = vcombine.high %v548_v28, %v563_v22 }
 0x3ce   : > { %v579_v40 = vrot.slane %v571_v34, %v3222_v42  ;;  %v586_v41 = vrot.slane %v572_v35, %v3222_v42 }
 0x3d0   : > { %v603_v50 = vcombine.high %v579_v40, %v3076_v8  ;;  %v604_v51 = vcombine.high %v586_v41, %v3076_v8  ;;  %v2896_v0 = vpack.c.bf16 %v595_v38, %v579_v40  ;;  %v2897_v2 = vpack.c.bf16 %v602_v39, %v586_v41 }
 0x3d2   : > { %v2898_v55 = vpack.c.bf16 %v605_v45, %v603_v50  ;;  %v2899_v56 = vpack.c.bf16 %v606_v1, %v604_v51 }
 0x3d4   : > { %v815_v7 = vrot.slane %v2898_v55, %v3215_v36  ;;  %v823_v9 = vrot.slane %v2899_v56, %v3215_v36 }
 0x3fb   : > { %v1142_v26 = vpop.trf.xlu0 }
 0x3fd   : > { %v1158_v17 = vpop.trf.xlu1 }
 0x3ff   : > { %v1206_v12 = vpop.trf.xlu0 }
 0x400   : > { %v1390_v53 = vcombine.low %v1142_v26, %v1206_v12 }
 0x401   : > { %v1350_v23 = vpop.trf.xlu1 }
 0x402   : > { %v1397_v4 = vrot.slane %v1390_v53, %v3215_v36 }
 0x403   : > { %v1270_v13 = vpop.trf.xlu0 }
 0x405   : > { %v1318_v32 = vpop.trf.xlu1 }
 0x407   : > { %v1334_v14 = vpop.trf.xlu0 }
 0x408   : > { %v1406_v57 = vcombine.low %v1270_v13, %v1334_v14  ;;  %v791_v13 = vrot.slane %v2896_v0, %v3215_v36  ;;  %v799_v14 = vrot.slane %v2897_v2, %v3215_v36  ;;  %v3084_v0 = vmov -1e+30  }
 0x409   : > { %v1382_v44 = vpop.trf.xlu1 }
 0x40a   : > { %v1463_v46 = vcombine.low %v1318_v32, %v1382_v44  ;;  %v1413_v10 = vrot.slane %v1406_v57, %v3215_v36 }
 0x40b   : > { %v1174_v16 = vpop.trf.xlu0 }
 0x40c   : > { %v1470_v58 = vrot.slane %v1463_v46, %v3215_v36 }
 0x40f   : > { %v1222_v18 = vpop.trf.xlu0 }
 0x410   : > { %v1439_v47 = vcombine.low %v1158_v17, %v1222_v18  ;;  %v824_v17 = vcombine.low %v815_v7, %v823_v9 }
 0x412   : > { %v1446_v59 = vrot.slane %v1439_v47, %v3215_v36  ;;  %v831_v25 = vrot.slane %v824_v17, %v3222_v42 }
 0x413   : > { %v1238_v21 = vpop.trf.xlu0 }
 0x414   : > { %v1398_v48 = vcombine.low %v1174_v16, %v1238_v21  ;;  %v800_v21 = vcombine.low %v791_v13, %v799_v14  ;;  %v836_v35 = vshrl.u32 %v831_v25, 16 }
 0x416   : > { %v1405_v60 = vrot.slane %v1398_v48, %v3215_v36  ;;  %v807_v28 = vrot.slane %v800_v21, %v3222_v42 }
 0x417   : > { %v1286_v27 = vpop.trf.xlu0 }
 0x418   : > { %v1455_v49 = vcombine.low %v1286_v27, %v1350_v23  ;;  %v1422_v11 = vcombine.low %v1397_v4, %v1405_v60  ;;  %v834_v31 = vpack.i.b16 %v831_v25, %v807_v28  ;;  %v835_v38 = vshrl.u32 %v807_v28, 16 }
 0x419   : > { %v701_v34 = vpop.permute.xlu1 %700 }
 0x41a   : > { %v1462_v61 = vrot.slane %v1455_v49, %v3215_v36  ;;  %v1429_v18 = vrot.slane %v1422_v11, %v3222_v42  ;;  %v726_v40 = vrot.slane %v701_v34, %v3215_v36  ;;  %v837_v44 = vpack.i.b16 %v836_v35, %v835_v38 }
 0x41b   : > { %v1302_v37 = vpop.trf.xlu0 }
 0x41c   : > { %v1479_v26 = vcombine.low %v1462_v61, %v1470_v58 }
 0x41e   : > { %v1486_v19 = vrot.slane %v1479_v26, %v3222_v42 }
 0x41f   : > { %v1190_v43 = vpop.trf.xlu0 }
 0x423   : > { %v1254_v52 = vpop.trf.xlu0 }
 0x424   : > { %v1447_v54 = vcombine.low %v1190_v43, %v1254_v52 }
 0x426   : > { %v1454_v63 = vrot.slane %v1447_v54, %v3215_v36 }
 0x427   : > { %v1366_v3 = vpop.trf.xlu0 }
 0x428   : > { %v1471_v5 = vcombine.low %v1446_v59, %v1454_v63  ;;  %v1414_v6 = vcombine.low %v1302_v37, %v1366_v3  ;;  %v719_v37 = vcombine.high %v701_v34, %v3076_v8  ;;  %v781_v63 = vand.u32 127, %v545_v29 }
 0x42a   : > { %v1421_v12 = vrot.slane %v1414_v6, %v3215_v36  ;;  %v1478_v15 = vrot.slane %v1471_v5, %v3222_v42  ;;  %v733_v45 = vrot.slane %v719_v37, %v3215_v36  ;;  %vm782_vm3 = vcmp.le.s32.totalorder %v781_v63, %v3212_v33 }
 0x42b   : > { %v783_v2 = vsel %vm782_vm3, 0.0, %v3084_v0 }
 0x42c   : > { %v1430_v16 = vcombine.low %v1413_v10, %v1421_v12  ;;  %v1487_v23 = vcombine.low %v1478_v15, %v1486_v19 }
 0x42e   : > { %v1437_v20 = vrot.slane %v1430_v16, %v3222_v42  ;;  %v1493_v30 = vshrl.u32 %v1487_v23, 16 }
 0x430   : > { %v1438_v24 = vcombine.low %v1429_v18, %v1437_v20 }
 0x432   : > { %v1490_v22 = vpack.i.b16 %v1487_v23, %v1438_v24  ;;  %v1492_v27 = vshrl.u32 %v1438_v24, 16 }
 0x434   : > { %2962 = vmatpush3.bf16.msra.mxu1 %v1490_v22  ;;  %v1494_v32 = vpack.i.b16 %v1493_v30, %v1492_v27 }
 0x435   : > { %2967 = vmatprep.subr.bf16.mxu1 %v3076_v8 }
 0x437   : > { %2964 = vmatmul.mubr.msk.bf16.vlgmr.msra.gmra.mrb[4].mxu1 %vm1496_vm2, %v834_v31 }
 0x438   : > { %2968 = vmatpush3.bf16.msra.mxu1 %v1494_v32  ;;  %2969 = vmatprep.mubr.msk.bf16.mxu1 %vm3077_vm1, %v3076_v8 }
 0x439   : > { %2979 = vmatprep.subr.bf16.mxu1 %v3076_v8 }
 0x43c   : > { %v699_v39 = vpop.permute.xlu0 %698 }
 0x43d   : > { %v704_v41 = vcombine.high %v699_v39, %v3076_v8  ;;  %v711_v43 = vrot.slane %v699_v39, %v3215_v36 }
 0x43f   : > { %v718_v1 = vrot.slane %v704_v41, %v3215_v36  ;;  %v734_v46 = vcombine.low %v711_v43, %v726_v40  ;;  %v735_v47 = vcombine.high %v711_v43, %v726_v40  ;;  %2970 = vmatmul.mubr.msk.bf16.vlgmr.msra.gmra.mrb[8].mxu1 %vm1496_vm2, %v837_v44 }
 0x440   : > { %2981 = vmatprep.mubr.msk.bf16.mxu1 %vm3077_vm1, %v3076_v8 }
 0x441   : > { %v742_v48 = vrot.slane %v734_v46, %v3222_v42  ;;  %v750_v49 = vcombine.low %v718_v1, %v733_v45  ;;  %v751_v50 = vcombine.high %v718_v1, %v733_v45  ;;  %v749_v51 = vrot.slane %v735_v47, %v3222_v42 }
 0x443   : > { %v770_v52 = vpack.c.bf16 %v742_v48, %v742_v48  ;;  %v766_v53 = vcombine.high %v742_v48, %v3076_v8  ;;  %v767_v54 = vcombine.high %v749_v51, %v3076_v8  ;;  %v758_v55 = vrot.slane %v750_v49, %v3222_v42 }
 0x444   : > { %v772_v59 = vpack.c.bf16 %v749_v51, %v749_v51  ;;  %v765_v13 = vrot.slane %v751_v50, %v3222_v42 }
 0x445   : > { %1608 = vxpose.xlu1.c.b16.start.end [1/1] (short) (narrow) %v770_v52, 16  ;;  %v771_v56 = vpack.c.bf16 %v766_v53, %v766_v53  ;;  %v773_v57 = vpack.c.bf16 %v767_v54, %v767_v54  ;;  %v768_v58 = vcombine.high %v758_v55, %v3076_v8  ;;  %v774_v61 = vpack.c.bf16 %v758_v55, %v758_v55 }
 0x446   : > { %v776_v14 = vpack.c.bf16 %v765_v13, %v765_v13  ;;  %v769_v15 = vcombine.high %v765_v13, %v3076_v8 }
 0x447   : > { %1624 = vxpose.xlu0.c.b16.start.end [1/1] (short) (narrow) %v771_v56, 16  ;;  %v775_v60 = vpack.c.bf16 %v768_v58, %v768_v58 }
 0x448   : > { %v777_v16 = vpack.c.bf16 %v769_v15, %v769_v15 }
 0x449   : > { %1656 = vxpose.xlu1.c.b16.start.end [1/1] (short) (narrow) %v773_v57, 16 }
 0x44b   : > { %1640 = vxpose.xlu0.c.b16.start.end [1/1] (short) (narrow) %v772_v59, 16 }
 0x44d   : > { %1688 = vxpose.xlu1.c.b16.start.end [1/1] (short) (narrow) %v775_v60, 16 }
 0x44f   : > { %1672 = vxpose.xlu0.c.b16.start.end [1/1] (short) (narrow) %v774_v61, 16 }
 0x4ab   : > { %v1616_v19 = vpop.trf.xlu1 }
 0x4ac   : > { %v1740_v22 = vshrl.u32 %v1616_v19, 16 }
 0x4ad   : > { %v1632_v17 = vpop.trf.xlu0 }
 0x4ae   : > { %v1741_v25 = vshrl.u32 %v1632_v17, 16  ;;  %v1738_v32 = vpack.i.b16 %v1632_v17, %v1616_v19 }
 0x4af   : > { %v1664_v21 = vpop.trf.xlu1 }
 0x4b0   : > { %v1742_v35 = vpack.i.b16 %v1741_v25, %v1740_v22  ;;  %v1749_v38 = vshrl.u32 %v1664_v21, 16 }
 0x4b1   : > { %v1648_v18 = vpop.trf.xlu0 }
 0x4b2   : > { %v1748_v37 = vshrl.u32 %v1648_v18, 16  ;;  %v1746_v43 = vpack.i.b16 %v1664_v21, %v1648_v18 }
 0x4b3   : > { %v1696_v24 = vpop.trf.xlu1 }
 0x4b4   : > { %v1757_v28 = vshrl.u32 %v1696_v24, 16  ;;  %v1750_v46 = vpack.i.b16 %v1749_v38, %v1748_v37 }
 0x4b5   : > { %v1680_v20 = vpop.trf.xlu0 }
 0x4b6   : > { %v1756_v27 = vshrl.u32 %v1680_v20, 16  ;;  %v1754_v34 = vpack.i.b16 %v1696_v24, %v1680_v20 }
 0x4b8   : > { %v1758_v39 = vpack.i.b16 %v1757_v28, %v1756_v27  ;;  %v1768_v44 = vcombine.low %v1738_v32, %v1754_v34  ;;  %v1769_v63 = vcombine.high %v1738_v32, %v1754_v34 }
 0x4ba   : > { %v1836_v47 = vcombine.low %v1742_v35, %v1758_v39  ;;  %v1776_v51 = vrot.slane %v1768_v44, %v3215_v36 }
 0x4bc   : > { %v1844_v54 = vrot.slane %v1836_v47, %v3215_v36 }
 0x50a   : > { %v1534_v3 = vpop.f32.mrb[4].mxu1 }
 0x50b   : > { %v3321_v4 = vadd.f32 %v1534_v3, %v783_v2  ;;  %v2965_v5 = vpop.f32.mrb[5].mxu1 }
 0x50c   : > { %v1537_v6 = vpop.f32.mrb[6].mxu1  ;;  %v1837_v5 = vcombine.high %v1742_v35, %v1758_v39 }
 0x50d   : > { %v2966_v7 = vpop.f32.mrb[7].mxu1  ;;  %v1584_v9 = vsel %vm1583_vm4, %v3321_v4, -inf }
 0x50e   : > { %1585 = vmax.xlane.f32.xlu0 %v1584_v9 }
 0x512   : > { %v1577_v10 = vpop.f32.mrb[8].mxu1 }
 0x513   : > { %v3325_v11 = vadd.f32 %v1577_v10, %v783_v2  ;;  %v2971_v26 = vpop.f32.mrb[9].mxu1  ;;  %v1783_v10 = vrot.slane %v1769_v63, %v3215_v36 }
 0x514   : > { %v1580_v29 = vpop.f32.mrb[10].mxu1 }
 0x515   : > { %v2972_v12 = vpop.f32.mrb[11].mxu1  ;;  %v1587_v33 = vsel %vm1583_vm4, %v3325_v11, -inf }
 0x516   : > { %1588 = vmax.xlane.f32.xlu1 %v1587_v33  ;;  %v1851_v33 = vrot.slane %v1837_v5, %v3215_v36 }
 0x53b   : > { %1704 = vxpose.xlu0.c.b16.start.end [1/1] (short) (narrow) %v776_v14, 16 }
 0x543   : > { %1720 = vxpose.xlu1.c.b16.start.end [1/1] (short) (narrow) %v777_v16, 16 }
 0x59b   : > { %v3331_v23 = vpop.xlane.xlu0 %1585 }
 0x59c   : > { %v1590_v16 = vsub.f32 %v3321_v4, %v3331_v23 }
 0x59e   : > { %v1592_v21 = vmul.f32 1.442695, %v1590_v16 }
 0x5a0   : > { %3055 = vpow2.f32 %v1592_v21 }
 0x5a1   : > { %v1712_v31 = vpop.trf.xlu0 }
 0x5a2   : > { %v1764_v40 = vshrl.u32 %v1712_v31, 16 }
 0x5a3   : > { %v3333_v30 = vpop.xlane.xlu1 %1588 }
 0x5a4   : > { %v1591_v18 = vsub.f32 %v3325_v11, %v3333_v30 }
 0x5a6   : > { %v1594_v22 = vmul.f32 1.442695, %v1591_v18 }
 0x5a8   : > { %3057 = vpow2.f32 %v1594_v22 }
 0x5a9   : > { %v1728_v41 = vpop.trf.xlu1 }
 0x5aa   : > { %v1762_v45 = vpack.i.b16 %v1728_v41, %v1712_v31  ;;  %v1765_v1 = vshrl.u32 %v1728_v41, 16  ;;  %v3056_v11 = vpop.eup %3055 }
 0x5ab   : > { %v1596_v28 = vsel %vm1583_vm4, %v3056_v11, 0.0 }
 0x5ac   : > { %v1766_v48 = vpack.i.b16 %v1765_v1, %v1764_v40  ;;  %v1784_v49 = vcombine.low %v1746_v43, %v1762_v45  ;;  %v1785_v59 = vcombine.high %v1746_v43, %v1762_v45 }
 0x5ae   : > { %v1852_v50 = vcombine.low %v1750_v46, %v1766_v48  ;;  %v1792_v52 = vrot.slane %v1784_v49, %v3215_v36  ;;  %v1853_v0 = vcombine.high %v1750_v46, %v1766_v48  ;;  %v1799_v7 = vrot.slane %v1785_v59, %v3215_v36 }
 0x5b0   : > { %v1800_v53 = vcombine.low %v1776_v51, %v1792_v52  ;;  %v1860_v55 = vrot.slane %v1852_v50, %v3215_v36  ;;  %v1801_v61 = vcombine.high %v1776_v51, %v1792_v52  ;;  %v1867_v26 = vrot.slane %v1853_v0, %v3215_v36 }
 0x5b1   : > { %v1816_v12 = vcombine.low %v1783_v10, %v1799_v7  ;;  %v1817_v20 = vcombine.high %v1783_v10, %v1799_v7 }
 0x5b2   : > { %v1808_v56 = vrot.slane %v1800_v53, %v3222_v42  ;;  %v1868_v57 = vcombine.low %v1844_v54, %v1860_v55  ;;  %v1869_v3 = vcombine.high %v1844_v54, %v1860_v55  ;;  %v1815_v6 = vrot.slane %v1801_v61, %v3222_v42  ;;  %v3058_v23 = vpop.eup %3057 }
 0x5b3   : > { %v1884_v14 = vcombine.low %v1851_v33, %v1867_v26  ;;  %v1824_v15 = vrot.slane %v1816_v12, %v3222_v42  ;;  %v1885_v25 = vcombine.high %v1851_v33, %v1867_v26  ;;  %v1831_v27 = vrot.slane %v1817_v20, %v3222_v42 }
 0x5b4   : > { %1904 = vxpose.xlu0.c.b16.start.end [1/1] (short) (narrow) %v1808_v56, 16  ;;  %v1876_v58 = vrot.slane %v1868_v57, %v3222_v42  ;;  %v1832_v60 = vcombine.high %v1808_v56, %v3082_v62  ;;  %v1883_v9 = vrot.slane %v1869_v3, %v3222_v42  ;;  %v1833_v29 = vcombine.high %v1815_v6, %v3082_v62 }
 0x5b5   : > { %v1892_v17 = vrot.slane %v1884_v14, %v3222_v42  ;;  %v1834_v19 = vcombine.high %v1824_v15, %v3082_v62  ;;  %v1899_v4 = vrot.slane %v1885_v25, %v3222_v42  ;;  %v1599_v30 = vsel %vm1583_vm4, %v3058_v23, 0.0 }
 0x5b6   : > { %1920 = vxpose.xlu1.c.b16.start.end [1/1] (short) (narrow) %v1876_v58, 16  ;;  %v1900_v2 = vcombine.high %v1876_v58, %v3082_v62  ;;  %v1901_v13 = vcombine.high %v1883_v9, %v3082_v62  ;;  %v1835_v31 = vcombine.high %v1831_v27, %v3082_v62 }
 0x5b7   : > { %v1902_v24 = vcombine.high %v1892_v17, %v3082_v62  ;;  %v1903_v32 = vcombine.high %v1899_v4, %v3082_v62 }
 0x5b8   : > { %1936 = vxpose.xlu0.c.b16.start.end [1/1] (short) (narrow) %v1832_v60, 16 }
 0x5ba   : > { %1952 = vxpose.xlu1.c.b16.start.end [1/1] (short) (narrow) %v1900_v2, 16 }
 0x5bc   : > { %1968 = vxpose.xlu0.c.b16.start.end [1/1] (short) (narrow) %v1815_v6, 16 }
 0x5be   : > { %1984 = vxpose.xlu1.c.b16.start.end [1/1] (short) (narrow) %v1883_v9, 16 }
 0x5c0   : > { %2000 = vxpose.xlu0.c.b16.start.end [1/1] (short) (narrow) %v1833_v29, 16 }
 0x5c2   : > { %2016 = vxpose.xlu1.c.b16.start.end [1/1] (short) (narrow) %v1901_v13, 16 }
 0x5c4   : > { %2032 = vxpose.xlu0.c.b16.start.end [1/1] (short) (narrow) %v1824_v15, 16 }
 0x5c6   : > { %2048 = vxpose.xlu1.c.b16.start.end [1/1] (short) (narrow) %v1892_v17, 16 }
 0x5c8   : > { %2064 = vxpose.xlu0.c.b16.start.end [1/1] (short) (narrow) %v1834_v19, 16 }
 0x5ca   : > { %2080 = vxpose.xlu1.c.b16.start.end [1/1] (short) (narrow) %v1902_v24, 16 }
 0x5cc   : > { %2096 = vxpose.xlu0.c.b16.start.end [1/1] (short) (narrow) %v1831_v27, 16 }
 0x5ce   : > { %2112 = vxpose.xlu1.c.b16.start.end [1/1] (short) (narrow) %v1899_v4, 16 }
 0x5d9   : > { %1597 = vadd.xlane.f32.xlu0 %v1596_v28 }
 0x5db   : > { %1600 = vadd.xlane.f32.xlu1 %v1599_v30 }
 0x606   : > { %2128 = vxpose.xlu0.c.b16.start.end [1/1] (short) (narrow) %v1835_v31, 16 }
 0x608   : > { %2144 = vxpose.xlu1.c.b16.start.end [1/1] (short) (narrow) %v1903_v32, 16 }
 0x61a   : > { %v1912_v34 = vpop.trf.xlu0 }
 0x61c   : > { %v1928_v35 = vpop.trf.xlu1 }
 0x61e   : > { %v1944_v37 = vpop.trf.xlu0 }
 0x620   : > { %v1960_v38 = vpop.trf.xlu1 }
 0x622   : > { %v1976_v39 = vpop.trf.xlu0 }
 0x623   : > { %v2160_v52 = vcombine.low %v1912_v34, %v1976_v39 }
 0x624   : > { %v1992_v40 = vpop.trf.xlu1 }
 0x625   : > { %v2209_v62 = vcombine.low %v1928_v35, %v1992_v40  ;;  %v2167_v60 = vrot.slane %v2160_v52, %v3215_v36 }
 0x626   : > { %v2008_v41 = vpop.trf.xlu0 }
 0x627   : > { %v2168_v53 = vcombine.low %v1944_v37, %v2008_v41  ;;  %v2216_v56 = vrot.slane %v2209_v62, %v3215_v36 }
 0x628   : > { %v2024_v43 = vpop.trf.xlu1 }
 0x629   : > { %v2217_v51 = vcombine.low %v1960_v38, %v2024_v43  ;;  %v2175_v61 = vrot.slane %v2168_v53, %v3215_v36  ;;  %v3041_v38 = vld [vmem:[%s3491_s5] sm:$0xff]  }
 0x62a   : > { %v2040_v44 = vpop.trf.xlu0 }
 0x62b   : > { %v2224_v57 = vrot.slane %v2217_v51, %v3215_v36  ;;  %v2192_v26 = vcombine.low %v2167_v60, %v2175_v61 }
 0x62c   : > { %v2056_v45 = vpop.trf.xlu1 }
 0x62d   : > { %v2241_v6 = vcombine.low %v2216_v56, %v2224_v57  ;;  %v2199_v18 = vrot.slane %v2192_v26, %v3222_v42  ;;  %v3042_v56 = vld [vmem:[%s3491_s5 + $0x8] sm:$0xff]  }
 0x62e   : > { %v2072_v1 = vpop.trf.xlu0 }
 0x62f   : > { %v2248_v16 = vrot.slane %v2241_v6, %v3222_v42 }
 0x630   : > { %v2088_v46 = vpop.trf.xlu1 }
 0x632   : > { %v2104_v47 = vpop.trf.xlu0 }
 0x633   : > { %v2176_v54 = vcombine.low %v2040_v44, %v2104_v47 }
 0x634   : > { %v2120_v48 = vpop.trf.xlu1 }
 0x635   : > { %v2225_v58 = vcombine.low %v2056_v45, %v2120_v48  ;;  %v2183_v0 = vrot.slane %v2176_v54, %v3215_v36 }
 0x637   : > { %v2232_v7 = vrot.slane %v2225_v58, %v3215_v36 }
 0x666   : > { %v1598_v49 = vpop.xlane.xlu0 %1597 }
 0x667   : > { %3059 = vrcp.f32 %v1598_v49 }
 0x668   : > { %v1601_v50 = vpop.xlane.xlu1 %1600 }
 0x669   : > { %3061 = vrcp.f32 %v1601_v50 }
 0x66c   : > { %v2136_v55 = vpop.trf.xlu0 }
 0x66d   : > { %v2184_v59 = vcombine.low %v2072_v1, %v2136_v55 }
 0x66e   : > { %v2152_v63 = vpop.trf.xlu1 }
 0x66f   : > { %v2191_v2 = vrot.slane %v2184_v59, %v3215_v36  ;;  %v2233_v3 = vcombine.low %v2088_v46, %v2152_v63 }
 0x671   : > { %v3060_v5 = vpop.eup %3059  ;;  %v2200_v9 = vcombine.low %v2183_v0, %v2191_v2  ;;  %v2240_v10 = vrot.slane %v2233_v3, %v3215_v36 }
 0x672   : > { %v1604_v29 = vmul.f32 %v3060_v5, %v3056_v11 }
 0x673   : > { %v3062_v12 = vpop.eup %3061  ;;  %v2249_v33 = vcombine.low %v2232_v7, %v2240_v10  ;;  %v2207_v13 = vrot.slane %v2200_v9, %v3222_v42 }
 0x674   : > { %v1606_v14 = vpack.c.bf16 %v1604_v29, %v1604_v29  ;;  %v1605_v15 = vmul.f32 %v3062_v12, %v3058_v23 }
 0x675   : > { %v2256_v17 = vrot.slane %v2249_v33, %v3222_v42  ;;  %v2208_v24 = vcombine.low %v2199_v18, %v2207_v13  ;;  %v3067_v13 = vld [vmem:[%s3172_s30] sm:$0xff]  ;;  %s435_s30 = scalar_lea.vmem %s3499_s13, %s2888_s27 }
 0x676   : > { %v2268_v19 = vsel %vm1583_vm4, %v1606_v14, 0  ;;  %v1607_v20 = vpack.c.bf16 %v1605_v15, %v1605_v15 }
 0x677   : > { %v2257_v21 = vcombine.low %v2248_v16, %v2256_v17  ;;  %2974 = vmatpush3.bf16.xpose.msra.mxu0 %v2268_v19  ;;  %v2261_v27 = vshrl.u32 %v2208_v24, 16 }
 0x678   : > { %v2315_v25 = vsel %vm1583_vm4, %v1607_v20, 0  ;;  %2985 = vmatprep.subr.bf16.mxu0 %v3076_v8 }
 0x679   : > { %2980 = vmatpush3.bf16.xpose.msra.mxu1 %v2315_v25  ;;  %v2262_v22 = vshrl.u32 %v2257_v21, 16  ;;  %v2260_v4 = vpack.i.b16 %v2257_v21, %v2208_v24  ;;  %v3043_v24 = vld [vmem:[%s3495_s9] sm:$0xff]   ;;  %v3044_v25 = vld [vmem:[%s3495_s9 + $0x8] sm:$0xff]  }
 0x67a   : > { %2993 = vmatprep.subr.bf16.mxu1 %v3076_v8 }
 0x67b   : > { %v2263_v11 = vpack.i.b16 %v2262_v22, %v2261_v27  ;;  %v3045_v22 = vld [vmem:[%s3497_s11] sm:$0xff]  }
 0x67e   : > { %2976 = vmatmul.mubr.msk.bf16.vlgmr.msra.gmra.mrb[0].mxu0 %vm1583_vm4, %v2260_v4 }
 0x67f   : > { %2989 = vmatprep.mubr.msk.bf16.mxu0 %vm3077_vm1, %v3076_v8  ;;  %2986 = vmatpush3.bf16.msra.mxu0 %v3041_v38  ;;  %v3047_v38 = vld [vmem:[%s3497_s11 + $0x10] sm:$0xff]  }
 0x680   : > { %2982 = vmatmul.mubr.msk.bf16.vlgmr.msra.gmra.mrb[12].mxu1 %vm1583_vm4, %v2263_v11  ;;  %2987 = vmatprep.subr.bf16.mxu0 %v3076_v8 }
 0x681   : > { %2997 = vmatprep.mubr.msk.bf16.mxu1 %vm3077_vm1, %v3076_v8  ;;  %2994 = vmatpush3.bf16.msra.mxu1 %v3043_v24 }
 0x682   : > { %2995 = vmatprep.subr.bf16.mxu1 %v3076_v8 }
 0x683   : > { %2988 = vmatpush3.bf16.msra.mxu0 %v3042_v56 }
 0x684   : > { %3001 = vmatprep.subr.bf16.mxu0 %v3076_v8 }
 0x685   : > { %2996 = vmatpush3.bf16.msra.mxu1 %v3044_v25 }
 0x751   : > { %v2304_v23 = vpop.f32.mrb[0].mxu0 }
 0x752   : > { %2358 = vxpose.xlu0.b32.start [1/2] (short) (narrow) %v2304_v23, 8  ;;  %v2977_v28 = vpop.f32.mrb[1].mxu0 }
 0x753   : > { %v2307_v30 = vpop.f32.mrb[2].mxu0  ;;  %v2351_v31 = vpop.f32.mrb[12].mxu1  ;;  %v2910_v28 = vld [vmem:[%s3493_s7] ss:$0 sm:$0xff] }
 0x754   : > { %v2978_v32 = vpop.f32.mrb[3].mxu0  ;;  %2390 = vxpose.xlu1.b32.start [1/2] (short) (narrow) %v2351_v31, 8  ;;  %v2983_v34 = vpop.f32.mrb[13].mxu1  ;;  %v2911_v31 = vld [vmem:[%s3494_s8] ss:$0 sm:$0xff] }
 0x755   : > { %v2354_v35 = vpop.f32.mrb[14].mxu1 }
 0x756   : > { %2359 = vxpose.xlu0.b32.end [2/2] (short) (narrow) %v2307_v30, 8  ;;  %v2984_v37 = vpop.f32.mrb[15].mxu1 }
 0x757   : > { %v3046_v37 = vld [vmem:[%s3497_s11 + $0x8] sm:$0xff]  }
 0x758   : > { %2391 = vxpose.xlu1.b32.end [2/2] (short) (narrow) %v2354_v35, 8 }
 0x7d2   : > { %v2374_v39 = vpop.trf.xlu0 }
 0x7d3   : > { %v2422_v40 = vcombine.high %v2374_v39, %v3076_v8  ;;  %v2429_v41 = vrot.slane %v2374_v39, %v3215_v36  ;;  %v3048_v39 = vld [vmem:[%s3497_s11 + $0x18] sm:$0xff]  }
 0x7d4   : > { %v2406_v43 = vpop.trf.xlu1 }
 0x7d5   : > { %v2436_v44 = vrot.slane %v2422_v40, %v3215_v36  ;;  %v2437_v45 = vcombine.high %v2406_v43, %v3076_v8  ;;  %v2444_v1 = vrot.slane %v2406_v43, %v3215_v36  ;;  %v3049_v40 = vld [vmem:[%s3497_s11 + $0x20] sm:$0xff]   ;;  %v3051_v43 = vld [vmem:[%s3497_s11 + $0x30] sm:$0xff]  }
 0x7d7   : > { %v2451_v46 = vrot.slane %v2437_v45, %v3215_v36  ;;  %v2452_v47 = vcombine.low %v2429_v41, %v2444_v1  ;;  %v2453_v48 = vcombine.high %v2429_v41, %v2444_v1  ;;  %v3050_v41 = vld [vmem:[%s3497_s11 + $0x28] sm:$0xff]   ;;  %v2912_v45 = vld [vmem:[%s3496_s10] ss:$0 sm:$0xff] }
 0x7d9   : > { %v2460_v49 = vrot.slane %v2452_v47, %v3222_v42  ;;  %v2467_v50 = vrot.slane %v2453_v48, %v3222_v42  ;;  %v2468_v62 = vcombine.low %v2436_v44, %v2451_v46  ;;  %v2469_v51 = vcombine.high %v2436_v44, %v2451_v46  ;;  %v3052_v44 = vld [vmem:[%s3497_s11 + $0x38] sm:$0xff]  }
 0x7db   : > { %v2476_v52 = vrot.slane %v2468_v62, %v3222_v42  ;;  %v2483_v53 = vrot.slane %v2469_v51, %v3222_v42  ;;  %v2488_v54 = vcombine.low %v2460_v49, %v2467_v50  ;;  %v2904_v55 = vcombine.high %v2460_v49, %v2467_v50 }
 0x7dd   : > { %v2495_v57 = vrot.slane %v2488_v54, %v3215_v36  ;;  %v2503_v58 = vrot.slane %v2904_v55, %v3215_v36  ;;  %v2504_v59 = vcombine.low %v2476_v52, %v2483_v53  ;;  %v2905_v60 = vcombine.high %v2476_v52, %v2483_v53 }
 0x7df   : > { %v2511_v61 = vrot.slane %v2504_v59, %v3215_v36  ;;  %v2519_v63 = vrot.slane %v2905_v60, %v3215_v36  ;;  %v2520_v0 = vcombine.low %v2495_v57, %v2503_v58  ;;  %v2906_v36 = vld [vmem:[%s3492_s6] ss:$0 sm:$0xff] }
 0x7e0   : > { %v2916_v58 = vld [vmem:[%s3498_s12] ss:$0 sm:$0xff] }
 0x7e1   : > { %v2528_v2 = vcombine.low %v2511_v61, %v2519_v63  ;;  %v2527_v3 = vrot.slane %v2520_v0, %v3222_v42 }
 0x7e3   : > { %v2535_v5 = vrot.slane %v2528_v2, %v3222_v42 }
 0x7e5   : > { %v2537_v6 = vcombine.high %v2527_v3, %v2535_v5  ;;  %v2536_v7 = vcombine.low %v2527_v3, %v2535_v5 }
 0x7e7   : > { %2539 = vrot.lane.b32.xlu0 %v2537_v6, %s3085_s18 }
 0x859   : > { %v2540_v9 = vpop.permute.xlu0 %2539 }
 0x85a   : > { %v2542_v10 = vsel %vm1496_vm2, %v2536_v7, %v2540_v9 }
 0x85b   : > { %v2543_v26 = vpack.c.bf16 %v2542_v10, %v2542_v10 }
 0x85d   : > { %2990 = vmatmul.mubr.msk.bf16.vlgmr.msra.gmra.mrb[4].mxu0 %vm440_vm0, %v2543_v26 }
 0x85e   : > { %3017 = vmatprep.mubr.msk.bf16.mxu0 %vm3077_vm1, %v3076_v8  ;;  %3002 = vmatpush3.bf16.msra.mxu0 %v3045_v22 }
 0x85f   : > { %3003 = vmatprep.subr.bf16.mxu0 %v3076_v8 }
 0x862   : > { %3004 = vmatpush3.bf16.msra.mxu0 %v3046_v37 }
 0x863   : > { %3005 = vmatprep.subr.bf16.mxu0 %v3076_v8 }
 0x866   : > { %3006 = vmatpush3.bf16.msra.mxu0 %v3047_v38 }
 0x867   : > { %3007 = vmatprep.subr.bf16.mxu0 %v3076_v8 }
 0x86a   : > { %3008 = vmatpush3.bf16.msra.mxu0 %v3048_v39 }
 0x86b   : > { %3009 = vmatprep.subr.bf16.mxu0 %v3076_v8 }
 0x86e   : > { %3010 = vmatpush3.bf16.msra.mxu0 %v3049_v40 }
 0x86f   : > { %3011 = vmatprep.subr.bf16.mxu0 %v3076_v8 }
 0x872   : > { %3012 = vmatpush3.bf16.msra.mxu0 %v3050_v41 }
 0x873   : > { %3013 = vmatprep.subr.bf16.mxu0 %v3076_v8 }
 0x876   : > { %3014 = vmatpush3.bf16.msra.mxu0 %v3051_v43 }
 0x877   : > { %3015 = vmatprep.subr.bf16.mxu0 %v3076_v8 }
 0x87a   : > { %3016 = vmatpush3.bf16.msra.mxu0 %v3052_v44 }
 0x930   : > { %v2604_v29 = vpop.f32.mrb[4].mxu0 }
 0x931   : > { %v2605_v12 = vadd.f32 %v2906_v36, %v2604_v29  ;;  %v2991_v42 = vpop.f32.mrb[5].mxu0 }
 0x932   : > { %v2607_v33 = vpop.f32.mrb[6].mxu0 }
 0x933   : > { %v3419_v14 = vadd.f32 %v3067_v13, %v2605_v12  ;;  %v2992_v15 = vpop.f32.mrb[7].mxu0 }
 0x935   : > { %v2613_v16 = vsel %vm440_vm0, %v3419_v14, 0.0 }
 0x936   : > { %2614 = vadd.xlane.f32.xlu1 %v2613_v16 }
 0x9c3   : > { %v2615_v17 = vpop.xlane.xlu1 %2614 }
 0x9c4   : > { %v2616_v18 = vmul.f32 0.03125, %v2615_v17 }
 0x9c6   : > { %v2617_v19 = vsub.f32 %v3419_v14, %v2616_v18 }
 0x9c8   : > { %v2618_v20 = vmul.f32 %v2617_v19, %v2617_v19 }
 0x9ca   : > { %v2619_v21 = vsel %vm440_vm0, %v2618_v20, 0.0 }
 0x9cb   : > { %2620 = vadd.xlane.f32.xlu0 %v2619_v21 }
 0xa58   : > { %v2621_v27 = vpop.xlane.xlu0 %2620 }
 0xa59   : > { %v2622_v4 = vmul.f32 0.03125, %v2621_v27 }
 0xa5b   : > { %v2623_v11 = vadd.f32 1e-05, %v2622_v4 }
 0xa5d   : > { %3063 = vrsqrt.f32 %v2623_v11 }
 0xa67   : > { %v3064_v23 = vpop.eup %3063 }
 0xa68   : > { %v2625_v30 = vmul.f32 %v3064_v23, %v2617_v19 }
 0xa6a   : > { %v2632_v32 = vmul.f32 %v2910_v28, %v2625_v30 }
 0xa6c   : > { %v2639_v34 = vadd.f32 %v2911_v31, %v2632_v32 }
 0xa6e   : > { %v2640_v35 = vpack.c.bf16 %v2639_v34, %v2639_v34 }
 0xa70   : > { %2998 = vmatmul.mubr.msk.bf16.vlgmr.msra.gmra.mrb[16].mxu1 %vm440_vm0, %v2640_v35 }
 0xb43   : > { %v2701_v1 = vpop.f32.mrb[16].mxu1 }
 0xb44   : > { %v2702_v46 = vadd.f32 %v2912_v45, %v2701_v1  ;;  %v2999_v47 = vpop.f32.mrb[17].mxu1 }
 0xb45   : > { %v2704_v48 = vpop.f32.mrb[18].mxu1 }
 0xb46   : > { %v2708_v49 = vmul.f32 %v2702_v46, %v2702_v46  ;;  %v3000_v50 = vpop.f32.mrb[19].mxu1  ;;  %v2707_v55 = vmul.f32 0.5, %v2702_v46 }
 0xb48   : > { %v2709_v62 = vmul.f32 %v2708_v49, %v2702_v46 }
 0xb4a   : > { %v2710_v51 = vmul.f32 0.044715, %v2709_v62 }
 0xb4c   : > { %v2711_v52 = vadd.f32 %v2710_v51, %v2702_v46 }
 0xb4e   : > { %v2712_v53 = vmul.f32 0.7978846, %v2711_v52 }
 0xb50   : > { %3065 = vtanh.f32 %v2712_v53 }
 0xb5a   : > { %v3066_v54 = vpop.eup %3065 }
 0xb5b   : > { %v2714_v8 = vadd.f32 1.0, %v3066_v54 }
 0xb5d   : > { %v2715_v56 = vmul.f32 %v2714_v8, %v2707_v55 }
 0xb5f   : > { %v2716_v57 = vpack.c.bf16 %v2715_v56, %v2715_v56 }
 0xb61   : > { %3018 = vmatmul.mubr.bf16.vlgmr.msra.gmra.mrb[8].mxu0 %v2716_v57 }
 0xc34   : > { %v2822_v59 = vpop.f32.mrb[8].mxu0 }
 0xc35   : > { %v2823_v60 = vadd.f32 %v2916_v58, %v2822_v59  ;;  %v3019_v61 = vpop.f32.mrb[9].mxu0 }
 0xc36   : > { %v2825_v63 = vpop.f32.mrb[10].mxu0 }
 0xc37   : > { %v2828_v0 = vadd.f32 %v2823_v60, %v3419_v14  ;;  %v3020_v2 = vpop.f32.mrb[11].mxu0 }
 0xc39   : > { %2829 = vst.msk [vmem:[%s435_s30] sm:$0xff] %vm440_vm0, %v2828_v0 }
 0xc3a PF: > { %s23_s25 = sadd.s32 1, %s3074_s25  }
 0xc3b   : > { %p20_p4 = scmp.ge.s32.totalorder %s23_s25, 4  }
 0xc3d   :  { %22 = sbr.rel (!%p20_p4) target bundleno = 1 (0x1), region = 102 }

</bundles_post_ra>
